<compile_context>
chip_gen: v7x
topology: tpu7x:2x2x1
jax: 0.10.0
libtpu: 0.0.40
codegen_flags: <defaults>
</compile_context>

<pallas_src>
import math
import functools

import jax
import jax.numpy as jnp
from jax import lax
from jax.experimental import pallas as pl
from jax.experimental.pallas import tpu as pltpu


# ----------------------------------------------------------------------------
# Pallas kernel
# ----------------------------------------------------------------------------
def _layernorm(x, gamma, beta, eps=1e-5):
    """LayerNorm over last dim, f32 math (matches PyTorch eps=1e-5)."""
    mu = jnp.mean(x, axis=-1, keepdims=True)
    var = jnp.mean((x - mu) ** 2, axis=-1, keepdims=True)
    return (x - mu) * lax.rsqrt(var + eps) * gamma + beta


def fused_text_encoder_kernel(
    qid_ref,   # (1, R, 1) f32  query batch-id within tile
    kid_ref,   # (1, 1, R) f32  key batch-id within tile, or -1.0 where the key is padded
    x_ref,     # (R, E)    f32  embeddings + positional encoding (rows of this batch tile)
    wqkv_ref,  # (1, E, 3E) bf16  packed [Wq*scale | Wk | Wv]   (layer-indexed)
    wo_ref,    # (1, E, E)  bf16
    w1_ref,    # (1, E, FF) bf16
    w2_ref,    # (1, FF, E) bf16
    vec_ref,   # (1, 8, P)  f32  rows: [bqkv | b1 | bo | b2 | ln1_w | ln1_b | ln2_w | ln2_b]
    o_ref,     # (R, E) f32  output block (written once, at the last layer)
    x_acc,     # VMEM scratch (R, E) f32 -- activations resident across the layer loop
    *, num_heads,
):
    layer = pl.program_id(1)
    n_layers = pl.num_programs(1)

    @pl.when(layer == 0)
    def _():
        x_acc[...] = x_ref[...]

    x = x_acc[...]                      # (R, E) f32
    R, E = x.shape
    H = num_heads
    dh = E // H
    FF = w1_ref.shape[2]

    # unpack the small per-layer vectors (static slices of one packed block)
    vecs = vec_ref[0]                   # (8, P) f32
    bqkv = vecs[0:1, :3 * E]            # (1, 3E)  [bq*scale | bk | bv]
    b1 = vecs[1:2, :FF]                 # (1, FF)
    bo = vecs[2:3, :E]
    b2 = vecs[3:4, :E]
    ln1w, ln1b = vecs[4:5, :E], vecs[5:6, :E]
    ln2w, ln2b = vecs[6:7, :E], vecs[7:8, :E]

    # --- self attention -------------------------------------------------------
    # fused QKV projection (bf16 operands, f32 accumulation); 1/sqrt(dh) pre-folded into Wq/bq
    xb = x.astype(jnp.bfloat16)
    qkv = jnp.dot(xb, wqkv_ref[0], preferred_element_type=jnp.float32) + bqkv   # (R, 3E)

    # head split: (R, 3E) -> three (H, R, dh) stacks, then both attention matmuls are
    # batched over heads.  TODO(synk): replace slices+stack with one reshape/transpose.
    qh = jnp.stack([qkv[:, h * dh:(h + 1) * dh] for h in range(H)],
                   axis=0).astype(jnp.bfloat16)                                  # (H, R, dh)
    kh = jnp.stack([qkv[:, E + h * dh:E + (h + 1) * dh] for h in range(H)],
                   axis=0).astype(jnp.bfloat16)
    vh = jnp.stack([qkv[:, 2 * E + h * dh:2 * E + (h + 1) * dh] for h in range(H)],
                   axis=0).astype(jnp.bfloat16)

    # scores[h, i, j] = <q_i^h, k_j^h>
    s = lax.dot_general(qh, kh, (((2,), (2,)), ((0,), (0,))),
                        preferred_element_type=jnp.float32)                      # (H, R, R)

    # in-kernel mask (no O(R^2) HBM input): key must be non-padded and in the same batch
    valid = qid_ref[0] == kid_ref[0]        # (R, 1) == (1, R) -> (R, R) bool
    s = jnp.where(valid, s, jnp.float32(-1e30))

    s = s - jnp.max(s, axis=-1, keepdims=True)
    p = jnp.exp(s)
    p = p * pl.reciprocal(jnp.sum(p, axis=-1, keepdims=True), approx=True)

    ctx = lax.dot_general(p.astype(jnp.bfloat16), vh, (((2,), (1,)), ((0,), (0,))),
                          preferred_element_type=jnp.float32)                    # (H, R, dh)
    ctx2 = jnp.concatenate([ctx[h] for h in range(H)], axis=-1)                  # (R, E)

    attn_out = jnp.dot(ctx2.astype(jnp.bfloat16), wo_ref[0],
                       preferred_element_type=jnp.float32) + bo

    # --- residual + layernorm 1 ----------------------------------------------
    h1 = _layernorm(x + attn_out, ln1w, ln1b)

    # --- feed forward (linear -> relu -> linear) ------------------------------
    ff = jnp.dot(h1.astype(jnp.bfloat16), w1_ref[0],
                 preferred_element_type=jnp.float32) + b1
    ff = jnp.maximum(ff, 0.0)
    ff = jnp.dot(ff.astype(jnp.bfloat16), w2_ref[0],
                 preferred_element_type=jnp.float32) + b2

    # --- residual + layernorm 2 ----------------------------------------------
    h2 = _layernorm(h1 + ff, ln2w, ln2b)
    x_acc[...] = h2

    # --- final L2 normalize (F.normalize(dim=-1)), fused into the last layer --
    @pl.when(layer == n_layers - 1)
    def _():
        ss = jnp.sum(h2 * h2, axis=-1, keepdims=True)
        # x / max(||x||, 1e-12) == x * rsqrt(max(sum(x^2), 1e-24))
        o_ref[...] = h2 * lax.rsqrt(jnp.maximum(ss, 1e-24))


# ----------------------------------------------------------------------------
# Wrappers
# ----------------------------------------------------------------------------
def run_text_encoder(x2d, qid, kid, fp, num_heads, rows_per_tile):
    """x2d: (B*S, E) f32; qid: (T, R, 1); kid: (T, 1, R); fp: fused/stacked params."""
    BS, E = x2d.shape
    T = qid.shape[0]
    R = rows_per_tile
    L = fp["wqkv"].shape[0]
    FF = fp["w1"].shape[2]
    P = fp["vec"].shape[2]

    # explicit per-generation VMEM budget: 2x-buffered bf16 layer weights + packed vectors
    # + x/out blocks + activation scratch + score/FF intermediates.  Capped at 64 MiB so the
    # same budget fits v7x physical VMEM; v5e/v6e have headroom above that.
    est = (2 * 2 * E * (3 * E + E + 2 * FF)                      # wqkv, wo, w1, w2 (bf16, 2-buf)
           + 2 * 4 * 8 * P                                       # packed small vectors
           + 2 * 2 * 4 * R * E                                   # x + out blocks (2-buf)
           + 4 * R * E                                           # x_acc scratch
           + 4 * (num_heads * R * R * 2 + 2 * R * FF + R * 3 * E))  # in-flight intermediates
    vmem_limit = int(min(max(2 * est, 32 * 2 ** 20), 64 * 2 ** 20))

    kernel = functools.partial(fused_text_encoder_kernel, num_heads=num_heads)
    return pl.pallas_call(
        kernel,
        out_shape=jax.ShapeDtypeStruct((BS, E), jnp.float32),
        grid=(T, L),
        in_specs=[
            pl.BlockSpec((1, R, 1), lambda t, l: (t, 0, 0)),       # qid (tile-indexed)
            pl.BlockSpec((1, 1, R), lambda t, l: (t, 0, 0)),       # kid (tile-indexed)
            pl.BlockSpec((R, E), lambda t, l: (t, 0)),             # x   (tile-indexed)
            pl.BlockSpec((1, E, 3 * E), lambda t, l: (l, 0, 0)),   # wqkv (layer-indexed)
            pl.BlockSpec((1, E, E), lambda t, l: (l, 0, 0)),       # wo
            pl.BlockSpec((1, E, FF), lambda t, l: (l, 0, 0)),      # w1
            pl.BlockSpec((1, FF, E), lambda t, l: (l, 0, 0)),      # w2
            pl.BlockSpec((1, 8, P), lambda t, l: (l, 0, 0)),       # packed bias/LN vectors
        ],
        out_specs=pl.BlockSpec((R, E), lambda t, l: (t, 0)),       # written once per tile
        scratch_shapes=[pltpu.VMEM((R, E), jnp.float32)],
        # tiles are independent (block-diagonal attention) -> "parallel" (sharded across
        # TensorCores on v7x); the layer axis carries x_acc state -> "arbitrary".
        compiler_params=pltpu.CompilerParams(
            dimension_semantics=("parallel", "arbitrary"),
            vmem_limit_bytes=vmem_limit,
        ),
    )(qid, kid, x2d, fp["wqkv"], fp["wo"], fp["w1"], fp["w2"], fp["vec"])


def make_positional_encoding(d_model, max_len=50):
    position = jnp.arange(max_len, dtype=jnp.float32)[:, None]
    div_term = jnp.exp(jnp.arange(0, d_model, 2, dtype=jnp.float32)
                       * (-math.log(10000.0) / d_model))
    pe = jnp.zeros((max_len, d_model), dtype=jnp.float32)
    pe = pe.at[:, 0::2].set(jnp.sin(position * div_term))
    pe = pe.at[:, 1::2].set(jnp.cos(position * div_term))
    return pe[None, :, :]                                           # (1, L, E)


def init_params(key, vocab_size, d_model, dim_ff, num_layers):
    keys = jax.random.split(key, 1 + num_layers)
    params = {}
    # nn.Embedding + init_weights(): uniform(-0.1, 0.1)
    params["word_embeddings"] = jax.random.uniform(
        keys[0], (vocab_size, d_model), jnp.float32, -0.1, 0.1)

    layers = []
    for li in range(num_layers):
        ks = jax.random.split(keys[1 + li], 8)
        s = 0.05
        layers.append({
            "wq": jax.random.normal(ks[0], (d_model, d_model), jnp.float32) * s,
            "wk": jax.random.normal(ks[1], (d_model, d_model), jnp.float32) * s,
            "wv": jax.random.normal(ks[2], (d_model, d_model), jnp.float32) * s,
            "wo": jax.random.normal(ks[3], (d_model, d_model), jnp.float32) * s,
            "bq": jnp.zeros((1, d_model), jnp.float32),
            "bk": jnp.zeros((1, d_model), jnp.float32),
            "bv": jnp.zeros((1, d_model), jnp.float32),
            "bo": jnp.zeros((1, d_model), jnp.float32),
            "w1": jax.random.normal(ks[4], (d_model, dim_ff), jnp.float32) * s,
            "b1": jnp.zeros((1, dim_ff), jnp.float32),
            "w2": jax.random.normal(ks[5], (dim_ff, d_model), jnp.float32) * s,
            "b2": jnp.zeros((1, d_model), jnp.float32),
            "ln1_w": jnp.ones((1, d_model), jnp.float32),
            "ln1_b": jnp.zeros((1, d_model), jnp.float32),
            "ln2_w": jnp.ones((1, d_model), jnp.float32),
            "ln2_b": jnp.zeros((1, d_model), jnp.float32),
        })
    params["layers"] = layers
    return params


def prepare_fused_params(layers, num_heads):
    """Stack per-layer params along a leading layer axis, pack QKV, fold the attention scale
    into the Q projection, cast matmul weights to bf16, and pack all small per-layer vectors
    into one (L, 8, P) block."""
    E = layers[0]["wq"].shape[0]
    FF = layers[0]["w1"].shape[1]
    dh = E // num_heads
    scale = 1.0 / math.sqrt(dh)
    P = max(3 * E, FF)

    def stack(fn):
        return jnp.stack([fn(p) for p in layers], axis=0)

    def pad_row(v, width):
        v = v.reshape(1, -1)
        return jnp.pad(v, ((0, 0), (0, width - v.shape[1])))

    def pack_vec(p):
        rows = [
            pad_row(jnp.concatenate([p["bq"] * scale, p["bk"], p["bv"]], axis=1), P),
            pad_row(p["b1"], P),
            pad_row(p["bo"], P),
            pad_row(p["b2"], P),
            pad_row(p["ln1_w"], P),
            pad_row(p["ln1_b"], P),
            pad_row(p["ln2_w"], P),
            pad_row(p["ln2_b"], P),
        ]
        return jnp.concatenate(rows, axis=0)                          # (8, P)

    return {
        "wqkv": stack(lambda p: jnp.concatenate(
            [p["wq"] * scale, p["wk"], p["wv"]], axis=1)).astype(jnp.bfloat16),   # (L, E, 3E)
        "wo": stack(lambda p: p["wo"]).astype(jnp.bfloat16),                      # (L, E, E)
        "w1": stack(lambda p: p["w1"]).astype(jnp.bfloat16),                      # (L, E, FF)
        "w2": stack(lambda p: p["w2"]).astype(jnp.bfloat16),                      # (L, FF, E)
        "vec": stack(pack_vec),                                                   # (L, 8, P) f32
    }


def text_encoder_forward(params, fused_params, pe, text_ids, text_masks, num_heads,
                         batches_per_tile=1):
    """
    text_ids:   (B, S) int32
    text_masks: (B, S) float/bool, nonzero => padded key position (PyTorch src_key_padding_mask)
    returns:    (B, S, E) float32, L2-normalized over last dim
    NOTE: for real workloads pick batches_per_tile so rows-per-tile >= 128/256 (fills the MXU)
          while keeping >= num_cores tiles for the parallel axis.
    """
    B, S = text_ids.shape
    E = params["word_embeddings"].shape[1]
    assert B % batches_per_tile == 0
    T = B // batches_per_tile
    R = batches_per_tile * S

    # embedding lookup (plain JAX gather) + positional encoding
    x = params["word_embeddings"][text_ids] + pe[:, :S, :]            # (B, S, E)
    x2d = x.reshape(B * S, E).astype(jnp.float32)

    # tiny per-token id vectors (mask is rebuilt in-kernel; no O((B*S)^2) bias array)
    local_b = (jnp.arange(R) // S).astype(jnp.float32)                # batch index within tile
    qid = jnp.broadcast_to(local_b[None, :, None], (T, R, 1)).astype(jnp.float32)
    pad = text_masks.astype(jnp.float32).reshape(T, 1, R)
    kid = jnp.where(pad > 0.5, -1.0, local_b[None, None, :]).astype(jnp.float32)

    out2d = run_text_encoder(x2d, qid, kid, fused_params, num_heads, R)
    return out2d.reshape(B, S, E)


# ----------------------------------------------------------------------------
# Main
# ----------------------------------------------------------------------------
if __name__ == "__main__":
    # small synthetic config (cfg.*)
    VOCAB_SIZE = 100
    EMBED = 32           # cfg.model.embedding_size
    NUM_HEADS = 4        # cfg.model.num_text_encoder_head
    NUM_LAYERS = 2       # cfg.model.num_text_encoder_layer
    DIM_FF = 2048        # nn.TransformerEncoderLayer default dim_feedforward
    B, S = 2, 8

    root = jax.random.PRNGKey(0)
    k_params, k_ids = jax.random.split(root)

    params = init_params(k_params, VOCAB_SIZE, EMBED, DIM_FF, NUM_LAYERS)
    fused_params = prepare_fused_params(params["layers"], NUM_HEADS)
    pe = make_positional_encoding(EMBED, max_len=50)

    text_ids = jax.random.randint(k_ids, (B, S), 0, VOCAB_SIZE, dtype=jnp.int32)
    # key padding mask: True/1.0 at padded positions (last tokens of sample 1 padded)
    lengths = jnp.array([S, 5], dtype=jnp.int32)
    text_masks = (jnp.arange(S)[None, :] >= lengths[:, None]).astype(jnp.float32)

    out = text_encoder_forward(params, fused_params, pe, text_ids, text_masks, NUM_HEADS,
                               batches_per_tile=1)
    out = jax.block_until_ready(out)

    assert out.shape == (B, S, EMBED) and out.dtype == jnp.float32
    assert bool(jnp.all(jnp.isfinite(out)))
    print("KERNEL_OK")
</pallas_src>

<mosaic_0001>
module attributes {stable_mosaic.version = 11 : i64} {
  func.func @fused_text_encoder_kernel(%arg0: i32, %arg1: i32, %arg2: memref<1x8x1xf32, #tpu.memory_space<vmem>>, %arg3: memref<1x1x8xf32, #tpu.memory_space<vmem>>, %arg4: memref<8x32xf32, #tpu.memory_space<vmem>>, %arg5: memref<1x32x96xbf16, #tpu.memory_space<vmem>>, %arg6: memref<1x32x32xbf16, #tpu.memory_space<vmem>>, %arg7: memref<1x32x2048xbf16, #tpu.memory_space<vmem>>, %arg8: memref<1x2048x32xbf16, #tpu.memory_space<vmem>>, %arg9: memref<1x8x2048xf32, #tpu.memory_space<vmem>>, %arg10: memref<8x32xf32, #tpu.memory_space<vmem>>, %arg11: memref<8x32xf32, #tpu.memory_space<vmem>>) attributes {dimension_semantics = [#tpu.dimension_semantics<parallel>, #tpu.dimension_semantics<arbitrary>], iteration_bounds = array<i64: 2, 2>, scalar_prefetch = 0 : i64, scratch_operands = 1 : i64, tpu.core_type = #tpu.core_type<tc>, window_params = [{transform_indices = @transform_0, window_bounds = array<i64: 1, 8, 1>}, {transform_indices = @transform_1, window_bounds = array<i64: 1, 1, 8>}, {transform_indices = @transform_2, window_bounds = array<i64: 8, 32>}, {transform_indices = @transform_3, window_bounds = array<i64: 1, 32, 96>}, {transform_indices = @transform_4, window_bounds = array<i64: 1, 32, 32>}, {transform_indices = @transform_5, window_bounds = array<i64: 1, 32, 2048>}, {transform_indices = @transform_6, window_bounds = array<i64: 1, 2048, 32>}, {transform_indices = @transform_7, window_bounds = array<i64: 1, 8, 2048>}, {transform_indices = @transform_8, window_bounds = array<i64: 8, 32>}]} {
    %c0_i32 = arith.constant 0 : i32
    %0 = arith.cmpi eq, %arg1, %c0_i32 : i32
    %1 = arith.extui %0 : i1 to i32
    %c0_i32_0 = arith.constant 0 : i32
    %2 = arith.cmpi ne, %1, %c0_i32_0 : i32
    scf.if %2 {
      %c0_45 = arith.constant 0 : index
      %c0_46 = arith.constant 0 : index
      %153 = vector.load %arg4[%c0_45, %c0_46] : memref<8x32xf32, #tpu.memory_space<vmem>>, vector<8x32xf32>
      %c0_47 = arith.constant 0 : index
      %c0_48 = arith.constant 0 : index
      %154 = vector.load %arg11[%c0_47, %c0_48] : memref<8x32xf32, #tpu.memory_space<vmem>>, vector<8x32xf32>
      tpu.vector_store %arg11[%c0_47, %c0_48], %153 {strides = array<i32>} : memref<8x32xf32, #tpu.memory_space<vmem>>, vector<8x32xf32>,
    } else {
    }
    %c0 = arith.constant 0 : index
    %c0_1 = arith.constant 0 : index
    %3 = vector.load %arg11[%c0, %c0_1] : memref<8x32xf32, #tpu.memory_space<vmem>>, vector<8x32xf32>
    %c0_2 = arith.constant 0 : index
    %c0_3 = arith.constant 0 : index
    %c0_4 = arith.constant 0 : index
    %4 = vector.load %arg9[%c0_2, %c0_3, %c0_4] : memref<1x8x2048xf32, #tpu.memory_space<vmem>>, vector<1x8x2048xf32>
    %5 = vector.shape_cast %4 : vector<1x8x2048xf32> to vector<8x2048xf32>
    %6 = vector.extract_strided_slice %5 {offsets = [0, 0], sizes = [1, 96], strides = [1, 1]} : vector<8x2048xf32> to vector<1x96xf32>
    %7 = vector.extract_strided_slice %5 {offsets = [1, 0], sizes = [1, 2048], strides = [1, 1]} : vector<8x2048xf32> to vector<1x2048xf32>
    %8 = vector.extract_strided_slice %5 {offsets = [2, 0], sizes = [1, 32], strides = [1, 1]} : vector<8x2048xf32> to vector<1x32xf32>
    %9 = vector.extract_strided_slice %5 {offsets = [3, 0], sizes = [1, 32], strides = [1, 1]} : vector<8x2048xf32> to vector<1x32xf32>
    %10 = vector.extract_strided_slice %5 {offsets = [4, 0], sizes = [1, 32], strides = [1, 1]} : vector<8x2048xf32> to vector<1x32xf32>
    %11 = vector.extract_strided_slice %5 {offsets = [5, 0], sizes = [1, 32], strides = [1, 1]} : vector<8x2048xf32> to vector<1x32xf32>
    %12 = vector.extract_strided_slice %5 {offsets = [6, 0], sizes = [1, 32], strides = [1, 1]} : vector<8x2048xf32> to vector<1x32xf32>
    %13 = vector.extract_strided_slice %5 {offsets = [7, 0], sizes = [1, 32], strides = [1, 1]} : vector<8x2048xf32> to vector<1x32xf32>
    %14 = arith.truncf %3 : vector<8x32xf32> to vector<8x32xbf16>
    %c0_5 = arith.constant 0 : index
    %c0_6 = arith.constant 0 : index
    %c0_7 = arith.constant 0 : index
    %15 = vector.load %arg5[%c0_5, %c0_6, %c0_7] : memref<1x32x96xbf16, #tpu.memory_space<vmem>>, vector<1x32x96xbf16>
    %16 = vector.shape_cast %15 : vector<1x32x96xbf16> to vector<32x96xbf16>
    %cst = arith.constant dense<0.000000e+00> : vector<8x96xf32>
    %17 = tpu.matmul %14, %16, %cst {dimension_numbers = #tpu.dot_dimension_numbers<[1], [0], [0], [1], [0, 0, 1, 1], [], []>} : vector<8x32xbf16>, vector<32x96xbf16>, vector<8x96xf32> -> vector<8x96xf32>
    %18 = vector.broadcast %6 : vector<1x96xf32> to vector<8x96xf32>
    %19 = arith.addf %17, %18 : vector<8x96xf32>
    %20 = vector.extract_strided_slice %19 {offsets = [0, 0], sizes = [8, 8], strides = [1, 1]} : vector<8x96xf32> to vector<8x8xf32>
    %21 = vector.extract_strided_slice %19 {offsets = [0, 8], sizes = [8, 8], strides = [1, 1]} : vector<8x96xf32> to vector<8x8xf32>
    %22 = vector.extract_strided_slice %19 {offsets = [0, 16], sizes = [8, 8], strides = [1, 1]} : vector<8x96xf32> to vector<8x8xf32>
    %23 = vector.extract_strided_slice %19 {offsets = [0, 24], sizes = [8, 8], strides = [1, 1]} : vector<8x96xf32> to vector<8x8xf32>
    %24 = vector.shape_cast %20 : vector<8x8xf32> to vector<1x8x8xf32>
    %25 = vector.shape_cast %21 : vector<8x8xf32> to vector<1x8x8xf32>
    %26 = vector.shape_cast %22 : vector<8x8xf32> to vector<1x8x8xf32>
    %27 = vector.shape_cast %23 : vector<8x8xf32> to vector<1x8x8xf32>
    %28 = tpu.concatenate %24, %25, %26, %27 in 0 : vector<1x8x8xf32>, vector<1x8x8xf32>, vector<1x8x8xf32>, vector<1x8x8xf32> -> vector<4x8x8xf32>
    %29 = arith.truncf %28 : vector<4x8x8xf32> to vector<4x8x8xbf16>
    %30 = vector.extract_strided_slice %19 {offsets = [0, 32], sizes = [8, 8], strides = [1, 1]} : vector<8x96xf32> to vector<8x8xf32>
    %31 = vector.extract_strided_slice %19 {offsets = [0, 40], sizes = [8, 8], strides = [1, 1]} : vector<8x96xf32> to vector<8x8xf32>
    %32 = vector.extract_strided_slice %19 {offsets = [0, 48], sizes = [8, 8], strides = [1, 1]} : vector<8x96xf32> to vector<8x8xf32>
    %33 = vector.extract_strided_slice %19 {offsets = [0, 56], sizes = [8, 8], strides = [1, 1]} : vector<8x96xf32> to vector<8x8xf32>
    %34 = vector.shape_cast %30 : vector<8x8xf32> to vector<1x8x8xf32>
    %35 = vector.shape_cast %31 : vector<8x8xf32> to vector<1x8x8xf32>
    %36 = vector.shape_cast %32 : vector<8x8xf32> to vector<1x8x8xf32>
    %37 = vector.shape_cast %33 : vector<8x8xf32> to vector<1x8x8xf32>
    %38 = tpu.concatenate %34, %35, %36, %37 in 0 : vector<1x8x8xf32>, vector<1x8x8xf32>, vector<1x8x8xf32>, vector<1x8x8xf32> -> vector<4x8x8xf32>
    %39 = arith.truncf %38 : vector<4x8x8xf32> to vector<4x8x8xbf16>
    %40 = vector.extract_strided_slice %19 {offsets = [0, 64], sizes = [8, 8], strides = [1, 1]} : vector<8x96xf32> to vector<8x8xf32>
    %41 = vector.extract_strided_slice %19 {offsets = [0, 72], sizes = [8, 8], strides = [1, 1]} : vector<8x96xf32> to vector<8x8xf32>
    %42 = vector.extract_strided_slice %19 {offsets = [0, 80], sizes = [8, 8], strides = [1, 1]} : vector<8x96xf32> to vector<8x8xf32>
    %43 = vector.extract_strided_slice %19 {offsets = [0, 88], sizes = [8, 8], strides = [1, 1]} : vector<8x96xf32> to vector<8x8xf32>
    %44 = vector.shape_cast %40 : vector<8x8xf32> to vector<1x8x8xf32>
    %45 = vector.shape_cast %41 : vector<8x8xf32> to vector<1x8x8xf32>
    %46 = vector.shape_cast %42 : vector<8x8xf32> to vector<1x8x8xf32>
    %47 = vector.shape_cast %43 : vector<8x8xf32> to vector<1x8x8xf32>
    %48 = tpu.concatenate %44, %45, %46, %47 in 0 : vector<1x8x8xf32>, vector<1x8x8xf32>, vector<1x8x8xf32>, vector<1x8x8xf32> -> vector<4x8x8xf32>
    %49 = arith.truncf %48 : vector<4x8x8xf32> to vector<4x8x8xbf16>
    %cst_8 = arith.constant dense<0.000000e+00> : vector<4x8x8xf32>
    %50 = tpu.matmul %29, %39, %cst_8 {dimension_numbers = #tpu.dot_dimension_numbers<[2], [2], [1], [1], [0, 0, 0, 1, 1, 1], [0], [0]>} : vector<4x8x8xbf16>, vector<4x8x8xbf16>, vector<4x8x8xf32> -> vector<4x8x8xf32>
    %c0_9 = arith.constant 0 : index
    %c0_10 = arith.constant 0 : index
    %c0_11 = arith.constant 0 : index
    %51 = vector.load %arg2[%c0_9, %c0_10, %c0_11] : memref<1x8x1xf32, #tpu.memory_space<vmem>>, vector<1x8x1xf32>
    %52 = vector.shape_cast %51 : vector<1x8x1xf32> to vector<8x1xf32>
    %c0_12 = arith.constant 0 : index
    %c0_13 = arith.constant 0 : index
    %c0_14 = arith.constant 0 : index
    %53 = vector.load %arg3[%c0_12, %c0_13, %c0_14] : memref<1x1x8xf32, #tpu.memory_space<vmem>>, vector<1x1x8xf32>
    %54 = vector.shape_cast %53 : vector<1x1x8xf32> to vector<1x8xf32>
    %55 = vector.broadcast %52 : vector<8x1xf32> to vector<8x8xf32>
    %56 = vector.broadcast %54 : vector<1x8xf32> to vector<8x8xf32>
    %57 = arith.cmpf oeq, %55, %56 : vector<8x8xf32>
    %cst_15 = arith.constant -1.000000e+30 : f32
    %58 = vector.shape_cast %57 : vector<8x8xi1> to vector<1x8x8xi1>
    %59 = vector.broadcast %58 : vector<1x8x8xi1> to vector<4x8x8xi1>
    %60 = vector.broadcast %cst_15 : f32 to vector<4x8x8xf32>
    %61 = arith.select %59, %50, %60 : vector<4x8x8xi1>, vector<4x8x8xf32>
    %cst_16 = arith.constant dense<0xFF800000> : vector<4x8xf32>
    %62 = vector.multi_reduction <maximumf>, %61, %cst_16 [2] : vector<4x8x8xf32> to vector<4x8xf32>
    %63 = vector.shape_cast %62 : vector<4x8xf32> to vector<4x8x1xf32>
    %64 = vector.broadcast %63 : vector<4x8x1xf32> to vector<4x8x8xf32>
    %65 = arith.subf %61, %64 : vector<4x8x8xf32>
    %66 = math.exp %65 : vector<4x8x8xf32>
    %cst_17 = arith.constant dense<0.000000e+00> : vector<4x8xf32>
    %67 = vector.multi_reduction <add>, %66, %cst_17 [2] : vector<4x8x8xf32> to vector<4x8xf32>
    %68 = vector.shape_cast %67 : vector<4x8xf32> to vector<4x8x1xf32>
    %69 = tpu.reciprocal %68 {approx = true} : vector<4x8x1xf32> -> vector<4x8x1xf32>
    %70 = vector.broadcast %69 : vector<4x8x1xf32> to vector<4x8x8xf32>
    %71 = arith.mulf %66, %70 : vector<4x8x8xf32>
    %72 = arith.truncf %71 : vector<4x8x8xf32> to vector<4x8x8xbf16>
    %cst_18 = arith.constant dense<0.000000e+00> : vector<4x8x8xf32>
    %73 = tpu.matmul %72, %49, %cst_18 {dimension_numbers = #tpu.dot_dimension_numbers<[2], [1], [1], [2], [0, 0, 0, 1, 1, 2], [0], [0]>} : vector<4x8x8xbf16>, vector<4x8x8xbf16>, vector<4x8x8xf32> -> vector<4x8x8xf32>
    %74 = vector.extract_strided_slice %73 {offsets = [0, 0, 0], sizes = [1, 8, 8], strides = [1, 1, 1]} : vector<4x8x8xf32> to vector<1x8x8xf32>
    %75 = vector.shape_cast %74 : vector<1x8x8xf32> to vector<8x8xf32>
    %76 = vector.extract_strided_slice %73 {offsets = [1, 0, 0], sizes = [1, 8, 8], strides = [1, 1, 1]} : vector<4x8x8xf32> to vector<1x8x8xf32>
    %77 = vector.shape_cast %76 : vector<1x8x8xf32> to vector<8x8xf32>
    %78 = vector.extract_strided_slice %73 {offsets = [2, 0, 0], sizes = [1, 8, 8], strides = [1, 1, 1]} : vector<4x8x8xf32> to vector<1x8x8xf32>
    %79 = vector.shape_cast %78 : vector<1x8x8xf32> to vector<8x8xf32>
    %80 = vector.extract_strided_slice %73 {offsets = [3, 0, 0], sizes = [1, 8, 8], strides = [1, 1, 1]} : vector<4x8x8xf32> to vector<1x8x8xf32>
    %81 = vector.shape_cast %80 : vector<1x8x8xf32> to vector<8x8xf32>
    %82 = tpu.concatenate %75, %77, %79, %81 in 1 : vector<8x8xf32>, vector<8x8xf32>, vector<8x8xf32>, vector<8x8xf32> -> vector<8x32xf32>
    %83 = arith.truncf %82 : vector<8x32xf32> to vector<8x32xbf16>
    %c0_19 = arith.constant 0 : index
    %c0_20 = arith.constant 0 : index
    %c0_21 = arith.constant 0 : index
    %84 = vector.load %arg6[%c0_19, %c0_20, %c0_21] : memref<1x32x32xbf16, #tpu.memory_space<vmem>>, vector<1x32x32xbf16>
    %85 = vector.shape_cast %84 : vector<1x32x32xbf16> to vector<32x32xbf16>
    %cst_22 = arith.constant dense<0.000000e+00> : vector<8x32xf32>
    %86 = tpu.matmul %83, %85, %cst_22 {dimension_numbers = #tpu.dot_dimension_numbers<[1], [0], [0], [1], [0, 0, 1, 1], [], []>} : vector<8x32xbf16>, vector<32x32xbf16>, vector<8x32xf32> -> vector<8x32xf32>
    %87 = vector.broadcast %8 : vector<1x32xf32> to vector<8x32xf32>
    %88 = arith.addf %86, %87 : vector<8x32xf32>
    %89 = arith.addf %3, %88 : vector<8x32xf32>
    %cst_23 = arith.constant dense<0.000000e+00> : vector<8xf32>
    %90 = vector.multi_reduction <add>, %89, %cst_23 [1] : vector<8x32xf32> to vector<8xf32>
    %91 = vector.shape_cast %90 : vector<8xf32> to vector<8x1xf32>
    %cst_24 = arith.constant 3.200000e+01 : f32
    %92 = vector.broadcast %cst_24 : f32 to vector<8x1xf32>
    %93 = arith.divf %91, %92 : vector<8x1xf32>
    %94 = vector.broadcast %93 : vector<8x1xf32> to vector<8x32xf32>
    %95 = arith.subf %89, %94 : vector<8x32xf32>
    %96 = arith.mulf %95, %95 : vector<8x32xf32>
    %cst_25 = arith.constant dense<0.000000e+00> : vector<8xf32>
    %97 = vector.multi_reduction <add>, %96, %cst_25 [1] : vector<8x32xf32> to vector<8xf32>
    %98 = vector.shape_cast %97 : vector<8xf32> to vector<8x1xf32>
    %cst_26 = arith.constant 3.200000e+01 : f32
    %99 = vector.broadcast %cst_26 : f32 to vector<8x1xf32>
    %100 = arith.divf %98, %99 : vector<8x1xf32>
    %101 = vector.broadcast %93 : vector<8x1xf32> to vector<8x32xf32>
    %102 = arith.subf %89, %101 : vector<8x32xf32>
    %cst_27 = arith.constant 9.99999974E-6 : f32
    %103 = vector.broadcast %cst_27 : f32 to vector<8x1xf32>
    %104 = arith.addf %100, %103 : vector<8x1xf32>
    %105 = math.rsqrt %104 : vector<8x1xf32>
    %106 = vector.broadcast %105 : vector<8x1xf32> to vector<8x32xf32>
    %107 = arith.mulf %102, %106 : vector<8x32xf32>
    %108 = vector.broadcast %10 : vector<1x32xf32> to vector<8x32xf32>
    %109 = arith.mulf %107, %108 : vector<8x32xf32>
    %110 = vector.broadcast %11 : vector<1x32xf32> to vector<8x32xf32>
    %111 = arith.addf %109, %110 : vector<8x32xf32>
    %112 = arith.truncf %111 : vector<8x32xf32> to vector<8x32xbf16>
    %c0_28 = arith.constant 0 : index
    %c0_29 = arith.constant 0 : index
    %c0_30 = arith.constant 0 : index
    %113 = vector.load %arg7[%c0_28, %c0_29, %c0_30] : memref<1x32x2048xbf16, #tpu.memory_space<vmem>>, vector<1x32x2048xbf16>
    %114 = vector.shape_cast %113 : vector<1x32x2048xbf16> to vector<32x2048xbf16>
    %cst_31 = arith.constant dense<0.000000e+00> : vector<8x2048xf32>
    %115 = tpu.matmul %112, %114, %cst_31 {dimension_numbers = #tpu.dot_dimension_numbers<[1], [0], [0], [1], [0, 0, 1, 1], [], []>} : vector<8x32xbf16>, vector<32x2048xbf16>, vector<8x2048xf32> -> vector<8x2048xf32>
    %116 = vector.broadcast %7 : vector<1x2048xf32> to vector<8x2048xf32>
    %117 = arith.addf %115, %116 : vector<8x2048xf32>
    %cst_32 = arith.constant 0.000000e+00 : f32
    %118 = vector.broadcast %cst_32 : f32 to vector<8x2048xf32>
    %119 = arith.maximumf %117, %118 : vector<8x2048xf32>
    %120 = arith.truncf %119 : vector<8x2048xf32> to vector<8x2048xbf16>
    %c0_33 = arith.constant 0 : index
    %c0_34 = arith.constant 0 : index
    %c0_35 = arith.constant 0 : index
    %121 = vector.load %arg8[%c0_33, %c0_34, %c0_35] : memref<1x2048x32xbf16, #tpu.memory_space<vmem>>, vector<1x2048x32xbf16>
    %122 = vector.shape_cast %121 : vector<1x2048x32xbf16> to vector<2048x32xbf16>
    %cst_36 = arith.constant dense<0.000000e+00> : vector<8x32xf32>
    %123 = tpu.matmul %120, %122, %cst_36 {dimension_numbers = #tpu.dot_dimension_numbers<[1], [0], [0], [1], [0, 0, 1, 1], [], []>} : vector<8x2048xbf16>, vector<2048x32xbf16>, vector<8x32xf32> -> vector<8x32xf32>
    %124 = vector.broadcast %9 : vector<1x32xf32> to vector<8x32xf32>
    %125 = arith.addf %123, %124 : vector<8x32xf32>
    %126 = arith.addf %111, %125 : vector<8x32xf32>
    %cst_37 = arith.constant dense<0.000000e+00> : vector<8xf32>
    %127 = vector.multi_reduction <add>, %126, %cst_37 [1] : vector<8x32xf32> to vector<8xf32>
    %128 = vector.shape_cast %127 : vector<8xf32> to vector<8x1xf32>
    %cst_38 = arith.constant 3.200000e+01 : f32
    %129 = vector.broadcast %cst_38 : f32 to vector<8x1xf32>
    %130 = arith.divf %128, %129 : vector<8x1xf32>
    %131 = vector.broadcast %130 : vector<8x1xf32> to vector<8x32xf32>
    %132 = arith.subf %126, %131 : vector<8x32xf32>
    %133 = arith.mulf %132, %132 : vector<8x32xf32>
    %cst_39 = arith.constant dense<0.000000e+00> : vector<8xf32>
    %134 = vector.multi_reduction <add>, %133, %cst_39 [1] : vector<8x32xf32> to vector<8xf32>
    %135 = vector.shape_cast %134 : vector<8xf32> to vector<8x1xf32>
    %cst_40 = arith.constant 3.200000e+01 : f32
    %136 = vector.broadcast %cst_40 : f32 to vector<8x1xf32>
    %137 = arith.divf %135, %136 : vector<8x1xf32>
    %138 = vector.broadcast %130 : vector<8x1xf32> to vector<8x32xf32>
    %139 = arith.subf %126, %138 : vector<8x32xf32>
    %cst_41 = arith.constant 9.99999974E-6 : f32
    %140 = vector.broadcast %cst_41 : f32 to vector<8x1xf32>
    %141 = arith.addf %137, %140 : vector<8x1xf32>
    %142 = math.rsqrt %141 : vector<8x1xf32>
    %143 = vector.broadcast %142 : vector<8x1xf32> to vector<8x32xf32>
    %144 = arith.mulf %139, %143 : vector<8x32xf32>
    %145 = vector.broadcast %12 : vector<1x32xf32> to vector<8x32xf32>
    %146 = arith.mulf %144, %145 : vector<8x32xf32>
    %147 = vector.broadcast %13 : vector<1x32xf32> to vector<8x32xf32>
    %148 = arith.addf %146, %147 : vector<8x32xf32>
    %c0_42 = arith.constant 0 : index
    %c0_43 = arith.constant 0 : index
    %149 = vector.load %arg11[%c0_42, %c0_43] : memref<8x32xf32, #tpu.memory_space<vmem>>, vector<8x32xf32>
    tpu.vector_store %arg11[%c0_42, %c0_43], %148 {strides = array<i32>} : memref<8x32xf32, #tpu.memory_space<vmem>>, vector<8x32xf32>,
    %c1_i32 = arith.constant 1 : i32
    %150 = arith.cmpi eq, %arg1, %c1_i32 : i32
    %151 = arith.extui %150 : i1 to i32
    %c0_i32_44 = arith.constant 0 : i32
    %152 = arith.cmpi ne, %151, %c0_i32_44 : i32
    scf.if %152 {
      %153 = arith.mulf %148, %148 : vector<8x32xf32>
      %cst_45 = arith.constant dense<0.000000e+00> : vector<8xf32>
      %154 = vector.multi_reduction <add>, %153, %cst_45 [1] : vector<8x32xf32> to vector<8xf32>
      %155 = vector.shape_cast %154 : vector<8xf32> to vector<8x1xf32>
      %cst_46 = arith.constant 1.000000e-24 : f32
      %156 = vector.broadcast %cst_46 : f32 to vector<8x1xf32>
      %157 = arith.maximumf %155, %156 : vector<8x1xf32>
      %158 = math.rsqrt %157 : vector<8x1xf32>
      %159 = vector.broadcast %158 : vector<8x1xf32> to vector<8x32xf32>
      %160 = arith.mulf %148, %159 : vector<8x32xf32>
      %c0_47 = arith.constant 0 : index
      %c0_48 = arith.constant 0 : index
      %161 = vector.load %arg10[%c0_47, %c0_48] : memref<8x32xf32, #tpu.memory_space<vmem>>, vector<8x32xf32>
      tpu.vector_store %arg10[%c0_47, %c0_48], %160 {strides = array<i32>} : memref<8x32xf32, #tpu.memory_space<vmem>>, vector<8x32xf32>,
    } else {
    }
    return
  }
  func.func @transform_0(%arg0: i32, %arg1: i32) -> (i32, i32, i32) {
    %c0_i32 = arith.constant 0 : i32
    %c0_i32_0 = arith.constant 0 : i32
    %c0_i32_1 = arith.constant 0 : i32
    return %arg0, %c0_i32, %c0_i32_0 : i32, i32, i32
  }
  func.func @transform_1(%arg0: i32, %arg1: i32) -> (i32, i32, i32) {
    %c0_i32 = arith.constant 0 : i32
    %c0_i32_0 = arith.constant 0 : i32
    %c0_i32_1 = arith.constant 0 : i32
    return %arg0, %c0_i32, %c0_i32_0 : i32, i32, i32
  }
  func.func @transform_2(%arg0: i32, %arg1: i32) -> (i32, i32) {
    %c0_i32 = arith.constant 0 : i32
    %c0_i32_0 = arith.constant 0 : i32
    return %arg0, %c0_i32 : i32, i32
  }
  func.func @transform_3(%arg0: i32, %arg1: i32) -> (i32, i32, i32) {
    %c0_i32 = arith.constant 0 : i32
    %c0_i32_0 = arith.constant 0 : i32
    %c0_i32_1 = arith.constant 0 : i32
    return %arg1, %c0_i32, %c0_i32_0 : i32, i32, i32
  }
  func.func @transform_4(%arg0: i32, %arg1: i32) -> (i32, i32, i32) {
    %c0_i32 = arith.constant 0 : i32
    %c0_i32_0 = arith.constant 0 : i32
    %c0_i32_1 = arith.constant 0 : i32
    return %arg1, %c0_i32, %c0_i32_0 : i32, i32, i32
  }
  func.func @transform_5(%arg0: i32, %arg1: i32) -> (i32, i32, i32) {
    %c0_i32 = arith.constant 0 : i32
    %c0_i32_0 = arith.constant 0 : i32
    %c0_i32_1 = arith.constant 0 : i32
    return %arg1, %c0_i32, %c0_i32_0 : i32, i32, i32
  }
  func.func @transform_6(%arg0: i32, %arg1: i32) -> (i32, i32, i32) {
    %c0_i32 = arith.constant 0 : i32
    %c0_i32_0 = arith.constant 0 : i32
    %c0_i32_1 = arith.constant 0 : i32
    return %arg1, %c0_i32, %c0_i32_0 : i32, i32, i32
  }
  func.func @transform_7(%arg0: i32, %arg1: i32) -> (i32, i32, i32) {
    %c0_i32 = arith.constant 0 : i32
    %c0_i32_0 = arith.constant 0 : i32
    %c0_i32_1 = arith.constant 0 : i32
    return %arg1, %c0_i32, %c0_i32_0 : i32, i32, i32
  }
  func.func @transform_8(%arg0: i32, %arg1: i32) -> (i32, i32) {
    %c0_i32 = arith.constant 0 : i32
    %c0_i32_0 = arith.constant 0 : i32
    return %arg0, %c0_i32 : i32, i32
  }
}

</mosaic_0001>

<bundles_post_ra>
// kernel: tpu_custom_call.1
= control target key start
LH: loop header
LB: loop body
LE: loop exit
PB: predicated region body
PF: predicated region fallthrough
CT: control target
= control target key end

     0   :  { %s4705_s0 = inlined_call_operand.vmem [shape: f32[2,8,1], index: 0, kind: input, shape index: {}]   ;;  %s4706_s1 = inlined_call_operand.vmem [shape: f32[2,1,8], index: 1, kind: input, shape index: {}]   ;;  %s4707_s2 = inlined_call_operand.vmem [shape: f32[16,32], index: 2, kind: input, shape index: {}]   ;;  %s4708_s3 = inlined_call_operand.vmem [shape: bf16[2,32,96], index: 3, kind: input, shape index: {}]   ;;  %s4709_s4 = inlined_call_operand.vmem [shape: bf16[2,32,32], index: 4, kind: input, shape index: {}]   ;;  %s4710_s5 = inlined_call_operand.vmem [shape: bf16[2,32,2048], index: 5, kind: input, shape index: {}]   ;;  %s4711_s6 = inlined_call_operand.vmem [shape: bf16[2,2048,32], index: 6, kind: input, shape index: {}]   ;;  %s4712_s7 = inlined_call_operand.vmem [shape: f32[2,8,2048], index: 7, kind: input, shape index: {}]   ;;  %s4713_s8 = inlined_call_operand.hbm [shape: f32[16,32], index: 8, kind: output, shape index: {}]  }
   0x1   :  { %4726 = sst [smem:[#allocation16_spill]] %s4705_s0 }
   0x2   :  { %4727 = sst [smem:[#allocation17_spill]] %s4707_s2 }
   0x3   :  { %4728 = sst [smem:[#allocation18_spill]] %s4713_s8 }
   0x4   :  { %13 = vsyncpa [#allocation4], 0 }
   0x5   :  { %15 = vsyncpa [#allocation4 + $0x1], 0  ;;  %s4148_s27 = smov 0   ;;  %s4150_s28 = smov 0  }
   0x6   :  { %s4152_s29 = smov 0   ;;  %s4154_s30 = smov 0  }
   0x7   :  { %s4156_s9 = smov 0   ;;  %s4158_s10 = smov 0  }
   0x8   :  { %s4160_s11 = smov 0   ;;  %s4162_s12 = smov 0  }
   0x9 LB: > { %4729 = sst [smem:[#allocation6_spill]] %s4061_s27  ;;  %s3282_s13 = sadd.s32 4294967295, %s4089_s12   ;;  %s4089_s12 = sphi %s4162_s12, %s21_s12   ;;  %s4085_s11 = sphi %s4160_s11, %s4755_s11   ;;  %s4081_s10 = sphi %s4158_s10, %s4754_s10   ;;  %s4077_s9 = sphi %s4156_s9, %s4753_s9   ;;  %s4073_s30 = sphi %s4154_s30, %s4758_s30   ;;  %s4069_s29 = sphi %s4152_s29, %s4751_s29   ;;  %s4065_s28 = sphi %s4150_s28, %s4757_s28   ;;  %s4061_s27 = sphi %s4148_s27, %s4756_s27  }
   0xa   : > { %4730 = sst [smem:[#allocation7_spill]] %s4069_s29  ;;  %s3283_s14 = sadd.s32 4294967294, %s4089_s12  }
   0xb   : > { %4731 = sst [smem:[#allocation8_spill]] %s4081_s10  ;;  %s30_s15 = sadd.s32 1, %s4081_s10 }
   0xc   : > { %4732 = sst [smem:[#allocation9_spill]] %s4085_s11  ;;  %p31_p0 = scmp.ge.s32.totalorder %s30_s15, 2 }
   0xd   : > { %4733 = sst [smem:[#allocation10_spill]] %s4089_s12  ;;  %s33_s16 = sadd.s32 1, %s4085_s11 }
   0xe   : > { %p258_p1 = scmp.ne.s32.totalorder %s4069_s29, %s4065_s28  ;;  %p259_p2 = scmp.eq.s32.totalorder %s3282_s13, 3 }
   0xf   : > { %s4760_s15 = smov (%p31_p0, %s30_s15), 0  ;;  %s4762_s16 = smov (!%p31_p0, %s33_s16), %s4085_s11 }
  0x10   : > { %4734 = sst [smem:[#allocation11_spill]] %s4760_s15  ;;  %p4197_p3 = por %p259_p2, %p258_p1 }
  0x11   : > { %p264_p4 = scmp.ne.s32.totalorder %s4065_s28, %s4061_s27  ;;  %p35_p5 = scmp.ge.s32.totalorder %s4762_s16, 2 }
  0x12   : > { %s4735_s17 = scalar_select %p4197_p3, 1, 0 }
  0x13   : > { %p265_p6 = scmp.eq.s32.totalorder %s3283_s14, 3  ;;  %p3286_p7 = scmp.ge.s32.totalorder %s4089_s12, 1 }
  0x14   : > { %4736 = sst [smem:[#allocation12_spill]] %s4735_s17  ;;  %p343_p8 = scmp.lt.s32.totalorder %s4089_s12, 5 }
  0x15   : > { %s4764_s16 = smov (%p35_p5, %s4762_s16), 0  ;;  %p4207_p9 = por %p265_p6, %p264_p4 }
  0x16   : > { %4737 = sst [smem:[#allocation13_spill]] %s4764_s16  ;;  %p344_p10 = pnand %p3286_p7, %p343_p8 }
  0x17   : > { %s4738_s18 = scalar_select %p4207_p9, 1, 0 }
  0x18   : > { %s245_s19 = ssub.s32 %s4085_s11, %s4764_s16  ;;  %s248_s20 = sadd.s32 1, %s4069_s29 }
  0x19   : > { %4739 = sst [smem:[#allocation14_spill]] %s4738_s18  ;;  %p246_p11 = scmp.eq.s32.totalorder %s245_s19, 0 }
  0x1a   : > { %347 = sbr.rel (%p344_p10) target bundleno = 2941 (0xb7d), region = 52  ;;  %s4716_s22 = sand.u32 (!%p344_p10), 1, %s4065_s28  }
  0x1b   : > { %s4215_s21 = scalar_select %p246_p11, %s4069_s29, %s248_s20  }
  0x1c   : > { %p408_p12 = scmp.lt.s32.totalorder (!%p344_p10), %s4077_s9, 1  ;;  %s4221_s23 = sshll.u32 (!%p344_p10), %s4716_s22, 3 }
  0x1d   : > { %4740 = sst [smem:[#allocation15_spill]] %s4215_s21  ;;  %p419_p13 = scmp.lt.s32.totalorder (!%p344_p10), %s4073_s30, 1 }
  0x1e   : > { %s4741_s0 = sld [smem:[#allocation16_spill]] (!%p344_p10)  ;;  %s4742_s2 = sld [smem:[#allocation17_spill]] (!%p344_p10) }
  0x1f   : > { %s407_s8 = scalar_lea.vmem (!%p344_p10), [#allocation3], %s4221_s23  ;;  %p3300_p0 = scmp.ne.s32.totalorder (!%p344_p10), %s4073_s30, 0 }
  0x21   : > { %s4225_s24 = scalar_select %p408_p12, %s4077_s9, 1 }
  0x22   : > { %s420_s25 = scalar_select %p419_p13, %s4073_s30, 1 }
  0x23   : > { %s3288_s26 = sshll.u32 %s4225_s24, 3  ;;  %448 = sbr.rel (%p3300_p0) target bundleno = 42 (0x2a), region = 56  ;;  %vm450_vm0 = vcmask (!%p3300_p0), 261120  }
  0x24   : > { %s4236_s15 = scalar_lea.vmem %s4741_s0, %s3288_s26  ;;  %s418_s10 = scalar_lea.vmem %s4742_s2, %s3288_s26 }
  0x25   : > { %s3489_s21 = sshll.u32 %s420_s25, 4  ;;  %s3491_s29 = sshll.u32 %s420_s25, 8  ;;  %v449_v0 = vld [vmem:[%s418_s10] sm:$0xff] (!%p3300_p0) }
  0x26   : > { %s423_s12 = scalar_lea.vmem %s4708_s3, %s3489_s21  ;;  %s4247_s13 = scalar_lea.vmem %s4709_s4, %s3489_s21  ;;  %451 = vst.msk [vmem:[#allocation2] sm:$0xff] (!%p3300_p0), %vm450_vm0, %v449_v0 }
  0x27   : > { %s4252_s16 = scalar_lea.vmem %s4710_s5, %s3491_s29  ;;  %s3492_s20 = sshll.u32 %s420_s25, 10 }
  0x28   : > { %s4257_s22 = scalar_lea.vmem %s4711_s6, %s3492_s20  ;;  %s3493_s26 = sshll.u32 %s420_s25, 7 }
  0x29   : > { %s4262_s18 = scalar_lea.vmem %s4712_s7, %s3493_s26 }
  0x2a PF: > { %v3840_v1 = vld [vmem:[%s423_s12] sm:$0xff]   ;;  %v4091_v2 = vmov 0.0   ;;  %v3841_v3 = vld [vmem:[%s423_s12 + $0x8] sm:$0xff]   ;;  %vm4092_vm1 = vmmov 0   ;;  %vm490_vm2 = vcmask 261120   ;;  %v474_v6 = vlaneseq  ;;  %s4093_s0 = smov 104   ;;  %s4743_s17 = scalar_lea.vmem %s4706_s1, %s4225_s24 }
  0x2b   : > { %3692 = vmatprep.subr.bf16.mxu0 %v4091_v2  ;;  %3700 = vmatprep.subr.bf16.mxu1 %v4091_v2  ;;  %v4285_v9 = vld [vmem:[%s4262_s18] sm:$0xff]  ;;  %s4094_s2 = smov 120   ;;  %v4095_v16 = vmov 0   ;;  %s4096_s29 = smov 112   ;;  %vm551_vm3 = vcmask 64512   ;;  %vm818_vm5 = vcmask 1043456  }
  0x2c   : > { %3693 = vmatpush3.bf16.msra.mxu0 %v3840_v1  ;;  %3696 = vmatprep.mubr.msk.bf16.mxu0 %vm4092_vm1, %v4091_v2  ;;  %v4281_v7 = vshrl.u32 %v474_v6, 7  ;;  %s4097_s10 = smov 96   ;;  %v745_v26 = vld [vmem:[%s4236_s15] sm:$0xff]  ;;  %s4098_s21 = smov 64   ;;  %vm1019_vm6 = vcmask 130048   ;;  %vm1021_vm7 = vcmask 195584  }
  0x2d   : > { %v4270_v4 = vld [vmem:[#allocation2] sm:$0xff]  ;;  %3694 = vmatprep.subr.bf16.mxu0 %v4091_v2  ;;  %3702 = vmatprep.mubr.msk.bf16.mxu1 %vm4092_vm1, %v4091_v2  ;;  %s4099_s24 = smov 8   ;;  %s4100_s25 = smov 16  }
  0x2e   : > { %v469_v5 = vpack.c.bf16 %v4270_v4, %v4270_v4  ;;  %v476_v8 = vsub.s32 0, %v4281_v7  ;;  %3838 = vset.pattern.permute.xlu1 %v4095_v16  ;;  %3839 = vset.pattern.permute.xlu0 %v4095_v16  ;;  %v3308_v33 = vld [vmem:[%s4743_s17] ss:$0 sm:$0xff]  ;;  %s4101_s19 = smov 24   ;;  %p3484_p1 = scmp.ne.s32.totalorder %s4073_s30, 1 }
  0x30   : > { %3695 = vmatpush3.bf16.msra.mxu0 %v3841_v3  ;;  %v477_v10 = vrot.slane %v4285_v9, %v476_v8 }
  0x31   : > { %3706 = vmatprep.subr.bf16.mxu0 %v4091_v2 }
  0x33   : > { %3697 = vmatmul.mubr.msk.bf16.vlgmr.msra.gmra.mrb[0].mxu0 %vm490_vm2, %v469_v5 }
  0x34   : > { %3708 = vmatprep.mubr.msk.bf16.mxu0 %vm4092_vm1, %v4091_v2 }
 0x106   : > { %v528_v11 = vpop.f32.mrb[0].mxu0 }
 0x107   : > { %v529_v12 = vadd.f32 %v528_v11, %v477_v10  ;;  %v3698_v13 = vpop.f32.mrb[1].mxu0 }
 0x108   : > { %v531_v14 = vpop.f32.mrb[2].mxu0 }
 0x109   : > { %541 = vrot.lane.b32.xlu1 %v529_v12, %s4093_s0  ;;  %535 = vrot.lane.b32.xlu0 %v529_v12, %s4094_s2  ;;  %v3699_v15 = vpop.f32.mrb[3].mxu0  ;;  %v4290_v17 = vpack.c.bf16 %v529_v12, %v529_v12 }
 0x10d   : > { %538 = vrot.lane.b32.xlu0 %v529_v12, %s4096_s29  ;;  %549 = vrot.lane.b32.xlu1 %v4290_v17, %s4097_s10 }
 0x17b   : > { %v542_v18 = vpop.permute.xlu1 %541  ;;  %v536_v19 = vpop.permute.xlu0 %535 }
 0x17c   : > { %v4293_v20 = vpack.c.bf16 %v536_v19, %v536_v19  ;;  %v4296_v23 = vpack.c.bf16 %v542_v18, %v542_v18 }
 0x17e   : > { %599 = vrot.lane.b32.xlu0 %v4293_v20, %s4097_s10 }
 0x17f   : > { %v539_v21 = vpop.permute.xlu0 %538  ;;  %v550_v22 = vpop.permute.xlu1 %549 }
 0x180   : > { %v4298_v24 = vpack.c.bf16 %v539_v21, %v539_v21  ;;  %v556_v25 = vsel %vm551_vm3, %v550_v22, 0 }
 0x181   : > { %3701 = vmatpush3.bf16.xpose.msra.mxu1 %v556_v25 }
 0x182   : > { %697 = vrot.lane.b32.xlu0 %v4296_v23, %s4097_s10  ;;  %648 = vrot.lane.b32.xlu1 %v4298_v24, %s4097_s10 }
 0x183   : > { %3712 = vmatprep.subr.bf16.mxu1 %v4091_v2 }
 0x186   : > { %749 = vperm.xlu1 %3838, %v745_v26  }
 0x188   : > { %3703 = vmatmul.mubr.msk.bf16.vlgmr.msra.gmra.mrb[0].mxu1 %vm551_vm3, %v4290_v17 }
 0x189   : > { %3714 = vmatprep.mubr.msk.bf16.mxu1 %vm4092_vm1, %v4091_v2 }
 0x1f0   : > { %v600_v27 = vpop.permute.xlu0 %599 }
 0x1f1   : > { %v605_v28 = vsel %vm551_vm3, %v600_v27, 0 }
 0x1f2   : > { %3707 = vmatpush3.bf16.xpose.msra.mxu0 %v605_v28 }
 0x1f3   : > { %3718 = vmatprep.subr.bf16.mxu0 %v4091_v2 }
 0x1f4   : > { %v649_v29 = vpop.permute.xlu1 %648  ;;  %v698_v31 = vpop.permute.xlu0 %697 }
 0x1f5   : > { %v654_v30 = vsel %vm551_vm3, %v649_v29, 0  ;;  %v703_v32 = vsel %vm551_vm3, %v698_v31, 0 }
 0x1f6   : > { %3713 = vmatpush3.bf16.xpose.msra.mxu1 %v654_v30 }
 0x1f7   : > { %3724 = vmatprep.subr.bf16.mxu1 %v4091_v2 }
 0x1f9   : > { %3709 = vmatmul.mubr.msk.bf16.vlgmr.msra.gmra.mrb[4].mxu0 %vm551_vm3, %v4293_v20 }
 0x1fa   : > { %3719 = vmatpush3.bf16.xpose.msra.mxu0 %v703_v32  ;;  %3720 = vmatprep.mubr.msk.bf16.mxu0 %vm4092_vm1, %v4091_v2 }
 0x1fb   : > { %3730 = vmatprep.subr.bf16.mxu0 %v4091_v2 }
 0x1fd   : > { %3715 = vmatmul.mubr.msk.bf16.vlgmr.msra.gmra.mrb[4].mxu1 %vm551_vm3, %v4298_v24 }
 0x1fe   : > { %3726 = vmatprep.mubr.msk.bf16.mxu1 %vm4092_vm1, %v4091_v2 }
 0x201   : > { %3721 = vmatmul.mubr.msk.bf16.vlgmr.msra.gmra.mrb[8].mxu0 %vm551_vm3, %v4296_v23 }
 0x202   : > { %3732 = vmatprep.mubr.msk.bf16.mxu0 %vm4092_vm1, %v4091_v2 }
 0x205   : > { %v750_v34 = vpop.permute.xlu1 %749 }
 0x206   : > { %vm758_vm4 = vcmp.eq.f32.partialorder %v750_v34, %v3308_v33 }
 0x25b   : > { %v592_v35 = vpop.f32.mrb[0].mxu1 }
 0x25c   : > { %v761_v36 = vsel %vm758_vm4, %v592_v35, -1e+30  ;;  %v3704_v37 = vpop.f32.mrb[1].mxu1 }
 0x25d   : > { %v595_v38 = vpop.f32.mrb[2].mxu1  ;;  %v765_v39 = vsel %vm551_vm3, %v761_v36, -inf }
 0x25e   : > { %v3705_v40 = vpop.f32.mrb[3].mxu1  ;;  %766 = vmax.xlane.f32.xlu0 %v765_v39 }
 0x2cc   : > { %v641_v41 = vpop.f32.mrb[4].mxu0 }
 0x2cd   : > { %v762_v42 = vsel %vm758_vm4, %v641_v41, -1e+30  ;;  %v3710_v43 = vpop.f32.mrb[5].mxu0 }
 0x2ce   : > { %v644_v44 = vpop.f32.mrb[6].mxu0  ;;  %v768_v45 = vsel %vm551_vm3, %v762_v42, -inf }
 0x2cf   : > { %769 = vmax.xlane.f32.xlu1 %v768_v45  ;;  %v3711_v46 = vpop.f32.mrb[7].mxu0 }
 0x2d0   : > { %v690_v47 = vpop.f32.mrb[4].mxu1 }
 0x2d1   : > { %v763_v48 = vsel %vm758_vm4, %v690_v47, -1e+30  ;;  %v3716_v49 = vpop.f32.mrb[5].mxu1 }
 0x2d2   : > { %v693_v50 = vpop.f32.mrb[6].mxu1  ;;  %v771_v51 = vsel %vm551_vm3, %v763_v48, -inf  ;;  %v3843_v49 = vld [vmem:[%s4247_s13 + $0x8] sm:$0xff]  }
 0x2d3   : > { %v3717_v52 = vpop.f32.mrb[7].mxu1  ;;  %772 = vmax.xlane.f32.xlu0 %v771_v51 }
 0x2d4   : > { %v739_v53 = vpop.f32.mrb[8].mxu0 }
 0x2d5   : > { %v764_v54 = vsel %vm758_vm4, %v739_v53, -1e+30  ;;  %v3722_v55 = vpop.f32.mrb[9].mxu0 }
 0x2d6   : > { %v742_v56 = vpop.f32.mrb[10].mxu0  ;;  %v774_v57 = vsel %vm551_vm3, %v764_v54, -inf }
 0x2d7   : > { %775 = vmax.xlane.f32.xlu0 %v774_v57  ;;  %v3723_v58 = vpop.f32.mrb[11].mxu0 }
 0x2e0   : > { %813 = vrot.lane.b32.xlu1 %v4290_v17, %s4098_s21 }
 0x2eb   : > { %v767_v59 = vpop.xlane.xlu0 %766 }
 0x2ec   : > { %v777_v60 = vsub.f32 %v761_v36, %v767_v59 }
 0x2ee   : > { %v781_v61 = vmul.f32 1.442695, %v777_v60 }
 0x2f0   : > { %3972 = vpow2.f32 %v781_v61 }
 0x2fa   : > { %v3973_v62 = vpop.eup %3972 }
 0x2fb   : > { %v789_v63 = vsel %vm551_vm3, %v3973_v62, 0.0 }
 0x304   : > { %790 = vadd.xlane.f32.xlu1 %v789_v63 }
 0x35c   : > { %v770_v0 = vpop.xlane.xlu1 %769 }
 0x35d   : > { %v778_v1 = vsub.f32 %v762_v42, %v770_v0 }
 0x35f   : > { %v783_v3 = vmul.f32 1.442695, %v778_v1 }
 0x360   : > { %v773_v5 = vpop.xlane.xlu0 %772  ;;  %v814_v6 = vpop.permute.xlu1 %813 }
 0x361   : > { %3974 = vpow2.f32 %v783_v3  ;;  %v779_v8 = vsub.f32 %v763_v48, %v773_v5  ;;  %v820_v10 = vsel %vm818_vm5, %v814_v6, 0  ;;  %v3842_v48 = vld [vmem:[%s4247_s13] sm:$0xff]   ;;  %v1030_v6 = vsub.s32 2, %v4281_v7 }
 0x362   : > { %3725 = vmatpush3.bf16.msra.mxu1 %v820_v10 }
 0x363   : > { %v785_v11 = vmul.f32 1.442695, %v779_v8  ;;  %3736 = vmatprep.subr.bf16.mxu1 %v4091_v2  ;;  %v1031_v8 = vrot.slane %v4285_v9, %v1030_v6 }
 0x364   : > { %v776_v12 = vpop.xlane.xlu0 %775 }
 0x365   : > { %3976 = vpow2.f32 %v785_v11  ;;  %v780_v13 = vsub.f32 %v764_v54, %v776_v12 }
 0x367   : > { %v787_v14 = vmul.f32 1.442695, %v780_v13 }
 0x369   : > { %3978 = vpow2.f32 %v787_v14 }
 0x36b   : > { %v3975_v15 = vpop.eup %3974 }
 0x36c   : > { %v792_v17 = vsel %vm551_vm3, %v3975_v15, 0.0 }
 0x36d   : > { %793 = vadd.xlane.f32.xlu0 %v792_v17 }
 0x36f   : > { %v3977_v18 = vpop.eup %3976 }
 0x370   : > { %v795_v19 = vsel %vm551_vm3, %v3977_v18, 0.0 }
 0x371   : > { %796 = vadd.xlane.f32.xlu1 %v795_v19 }
 0x373   : > { %v3979_v21 = vpop.eup %3978 }
 0x374   : > { %v798_v22 = vsel %vm551_vm3, %v3979_v21, 0.0 }
 0x375   : > { %799 = vadd.xlane.f32.xlu0 %v798_v22 }
 0x382   : > { %910 = vrot.lane.b32.xlu1 %v4298_v24, %s4098_s21 }
 0x386   : > { %958 = vrot.lane.b32.xlu1 %v4296_v23, %s4098_s21 }
 0x38b   : > { %862 = vrot.lane.b32.xlu0 %v4293_v20, %s4098_s21 }
 0x391   : > { %v791_v25 = vpop.xlane.xlu1 %790 }
 0x392   : > { %3980 = vrcp.f32 %v791_v25 }
 0x39c   : > { %v3981_v26 = vpop.eup %3980 }
 0x39d   : > { %v805_v27 = vmul.f32 %v3981_v26, %v3973_v62  ;;  %v1113_v26 = vld [vmem:[%s4252_s16] sm:$0xff] }
 0x39f   : > { %v809_v28 = vpack.c.bf16 %v805_v27, %v805_v27  ;;  %v1121_v27 = vld [vmem:[%s4252_s16 + $0x40] sm:$0xff] }
 0x3a1   : > { %3727 = vmatmul.mubr.msk.bf16.vlgmr.msra.gmra.mrb[8].mxu1 %vm551_vm3, %v809_v28  ;;  %v1114_v28 = vld [vmem:[%s4252_s16 + $0x8] sm:$0xff] }
 0x3a2   : > { %3738 = vmatprep.mubr.msk.bf16.mxu1 %vm4092_vm1, %v4091_v2 }
 0x3fa   : > { %v794_v29 = vpop.xlane.xlu0 %793 }
 0x3fb   : > { %3982 = vrcp.f32 %v794_v29  ;;  %v3317_v29 = vcombine.high %v1113_v26, %v1121_v27 }
 0x3fe   : > { %v797_v30 = vpop.xlane.xlu1 %796 }
 0x3ff   : > { %3984 = vrcp.f32 %v797_v30  ;;  %v1122_v30 = vld [vmem:[%s4252_s16 + $0x48] sm:$0xff] }
 0x402   : > { %v911_v24 = vpop.permute.xlu1 %910  ;;  %v800_v31 = vpop.xlane.xlu0 %799 }
 0x403   : > { %v916_v23 = vsel %vm818_vm5, %v911_v24, 0  ;;  %3986 = vrcp.f32 %v800_v31  ;;  %v3318_v24 = vcombine.low %v1114_v28, %v1122_v30  ;;  %v3319_v31 = vcombine.high %v1114_v28, %v1122_v30 }
 0x404   : > { %3737 = vmatpush3.bf16.msra.mxu1 %v916_v23  ;;  %v1129_v23 = vld [vmem:[%s4252_s16 + $0x80] sm:$0xff] }
 0x405   : > { %v3983_v20 = vpop.eup %3982  ;;  %3748 = vmatprep.subr.bf16.mxu1 %v4091_v2 }
 0x406   : > { %v806_v32 = vmul.f32 %v3983_v20, %v3975_v15  ;;  %v863_v33 = vpop.permute.xlu0 %862  ;;  %v959_v35 = vpop.permute.xlu1 %958  ;;  %v1137_v20 = vld [vmem:[%s4252_s16 + $0xc0] sm:$0xff] }
 0x407   : > { %v868_v34 = vsel %vm818_vm5, %v863_v33, 0  ;;  %v964_v39 = vsel %vm818_vm5, %v959_v35, 0  ;;  %v3333_v33 = vcombine.high %v1129_v23, %v1137_v20  ;;  %v3332_v35 = vcombine.low %v1129_v23, %v1137_v20  ;;  %v1144_v23 = vld [vmem:[%s4252_s16 + $0xf8] sm:$0xff] }
 0x408   : > { %3731 = vmatpush3.bf16.msra.mxu0 %v868_v34  ;;  %v810_v36 = vpack.c.bf16 %v806_v32, %v806_v32  ;;  %v1130_v32 = vld [vmem:[%s4252_s16 + $0x88] sm:$0xff] }
 0x409   : > { %v3985_v37 = vpop.eup %3984  ;;  %3742 = vmatprep.subr.bf16.mxu0 %v4091_v2  ;;  %v1138_v34 = vld [vmem:[%s4252_s16 + $0xc8] sm:$0xff] }
 0x40a   : > { %v807_v38 = vmul.f32 %v3985_v37, %v3977_v18  ;;  %v3335_v37 = vcombine.high %v1130_v32, %v1138_v34 }
 0x40b   : > { %3733 = vmatmul.mubr.msk.bf16.vlgmr.msra.gmra.mrb[12].mxu0 %vm551_vm3, %v810_v36  ;;  %v3334_v36 = vcombine.low %v1130_v32, %v1138_v34 }
 0x40c   : > { %3743 = vmatpush3.bf16.msra.mxu0 %v964_v39  ;;  %v811_v40 = vpack.c.bf16 %v807_v38, %v807_v38  ;;  %3744 = vmatprep.mubr.msk.bf16.mxu0 %vm4092_vm1, %v4091_v2  ;;  %v1115_v38 = vld [vmem:[%s4252_s16 + $0x10] sm:$0xff] }
 0x40d   : > { %v3987_v41 = vpop.eup %3986  ;;  %1372 = vmatprep.subr.bf16.mxu0 %v3317_v29  ;;  %v1123_v39 = vld [vmem:[%s4252_s16 + $0x50] sm:$0xff] }
 0x40e   : > { %v808_v42 = vmul.f32 %v3987_v41, %v3979_v21  ;;  %3739 = vmatmul.mubr.msk.bf16.vlgmr.msra.gmra.mrb[12].mxu1 %vm551_vm3, %v811_v40  ;;  %v1116_v40 = vld [vmem:[%s4252_s16 + $0x18] sm:$0xff]  ;;  %v3321_v41 = vcombine.high %v1115_v38, %v1123_v39 }
 0x40f   : > { %3752 = vmatprep.mubr.msk.bf16.mxu1 %vm4092_vm1, %v4091_v2  ;;  %3749 = vmatpush3.bf16.msra.mxu1 %v3842_v48 }
 0x410   : > { %v812_v43 = vpack.c.bf16 %v808_v42, %v808_v42  ;;  %3750 = vmatprep.subr.bf16.mxu1 %v4091_v2  ;;  %v1124_v42 = vld [vmem:[%s4252_s16 + $0x58] sm:$0xff] }
 0x413   : > { %3745 = vmatmul.mubr.msk.bf16.vlgmr.msra.gmra.mrb[16].mxu0 %vm551_vm3, %v812_v43  ;;  %3751 = vmatpush3.bf16.msra.mxu1 %v3843_v49  ;;  %v3320_v43 = vcombine.low %v1115_v38, %v1123_v39  ;;  %v1104_v49 = vsub.s32 4, %v4281_v7  ;;  %v3845_v38 = vld [vmem:[%s4257_s22 + $0xc0] sm:$0xff]  }
 0x414   : > { %1404 = vmatprep.mubr.bf16.mxu0 %v4095_v16  ;;  %1413 = vmatprep.subr.bf16.mxu1 %v3319_v31  ;;  %v1136_v31 = vld [vmem:[%s4252_s16 + $0xb8] sm:$0xff]  ;;  %v3846_v39 = vld [vmem:[%s4257_s22] sm:$0xff]  }
 0x415   : > { %v3347_v34 = vcombine.high %v1136_v31, %v1144_v23 }
 0x474   : > { %v856_v44 = vpop.f32.mrb[8].mxu1 }
 0x475   : > { %v3728_v45 = vpop.f32.mrb[9].mxu1 }
 0x476   : > { %v859_v46 = vpop.f32.mrb[10].mxu1  ;;  %v3323_v45 = vcombine.high %v1116_v40, %v1124_v42 }
 0x477   : > { %v3729_v47 = vpop.f32.mrb[11].mxu1 }
 0x4de   : > { %v904_v50 = vpop.f32.mrb[12].mxu0 }
 0x4df   : > { %1007 = vrot.lane.b32.xlu0 %v904_v50, %s4099_s24  ;;  %v3734_v51 = vpop.f32.mrb[13].mxu0  ;;  %v1109_v50 = vsub.s32 5, %v4281_v7 }
 0x4e0   : > { %v907_v52 = vpop.f32.mrb[14].mxu0  ;;  %v1105_v51 = vrot.slane %v4285_v9, %v1104_v49  ;;  %v3857_v49 = vld [vmem:[%s4257_s22 + $0xd8] sm:$0xff]  }
 0x4e1   : > { %v3735_v53 = vpop.f32.mrb[15].mxu0  ;;  %v952_v54 = vpop.f32.mrb[12].mxu1 }
 0x4e2   : > { %1011 = vrot.lane.b32.xlu1 %v952_v54, %s4100_s25  ;;  %v3740_v55 = vpop.f32.mrb[13].mxu1  ;;  %v1110_v53 = vrot.slane %v4285_v9, %v1109_v50  ;;  %v3858_v50 = vld [vmem:[%s4257_s22 + $0x18] sm:$0xff]  }
 0x4e3   : > { %v955_v56 = vpop.f32.mrb[14].mxu1 }
 0x4e4   : > { %v3741_v57 = vpop.f32.mrb[15].mxu1  ;;  %v1131_v56 = vld [vmem:[%s4252_s16 + $0x90] sm:$0xff] }
 0x4e5   : > { %v1139_v57 = vld [vmem:[%s4252_s16 + $0xd0] sm:$0xff] }
 0x4e6   : > { %v1000_v58 = vpop.f32.mrb[16].mxu0 }
 0x4e7   : > { %1015 = vrot.lane.b32.xlu0 %v1000_v58, %s4101_s19  ;;  %v3746_v59 = vpop.f32.mrb[17].mxu0  ;;  %v1132_v58 = vld [vmem:[%s4252_s16 + $0x98] sm:$0xff] }
 0x4e8   : > { %v1003_v60 = vpop.f32.mrb[18].mxu0  ;;  %v1140_v59 = vld [vmem:[%s4252_s16 + $0xd8] sm:$0xff] }
 0x4e9   : > { %v3747_v2 = vpop.f32.mrb[19].mxu0  ;;  %v3338_v6 = vcombine.low %v1132_v58, %v1140_v59 }
 0x551   : > { %v1008_v61 = vpop.permute.xlu0 %1007 }
 0x552   : > { %v1018_v63 = vsel %vm551_vm3, %v856_v44, %v1008_v61  ;;  %v3322_v44 = vcombine.low %v1116_v40, %v1124_v42  ;;  %v3337_v61 = vcombine.high %v1131_v56, %v1139_v57  ;;  %v3847_v40 = vld [vmem:[%s4257_s22 + $0x80] sm:$0xff]   ;;  %v3849_v42 = vld [vmem:[%s4257_s22 + $0xc8] sm:$0xff]  }
 0x554   : > { %v1012_v62 = vpop.permute.xlu1 %1011 }
 0x555   : > { %v1020_v0 = vsel %vm1019_vm6, %v1018_v63, %v1012_v62  ;;  %v3339_v62 = vcombine.high %v1132_v58, %v1140_v59  ;;  %v1117_v63 = vld [vmem:[%s4252_s16 + $0x20] sm:$0xff]  ;;  %v3866_v58 = vld [vmem:[%s4257_s22 + $0x28] sm:$0xff]  }
 0x556   : > { %v3867_v59 = vld [vmem:[%s4257_s22 + $0xa8] sm:$0xff]  }
 0x559   : > { %v1016_v1 = vpop.permute.xlu0 %1015 }
 0x55a   : > { %v1022_v3 = vsel %vm1021_vm7, %v1020_v0, %v1016_v1  ;;  %v1125_v0 = vld [vmem:[%s4252_s16 + $0x60] sm:$0xff]  ;;  %v1118_v1 = vld [vmem:[%s4252_s16 + $0x28] sm:$0xff] }
 0x55b   : > { %v1023_v5 = vpack.c.bf16 %v1022_v3, %v1022_v3  ;;  %v1126_v3 = vld [vmem:[%s4252_s16 + $0x68] sm:$0xff] }
 0x55d   : > { %3753 = vmatmul.mubr.msk.bf16.vlgmr.msra.gmra.mrb[16].mxu1 %vm490_vm2, %v1023_v5  ;;  %v3336_v5 = vcombine.low %v1131_v56, %v1139_v57  ;;  %v3864_v56 = vld [vmem:[%s4257_s22 + $0x68] sm:$0xff]  }
 0x55e   : > { %1445 = vmatprep.mubr.bf16.mxu1 %v4095_v16  ;;  %1414 = vmatpush1.bf16.msra.mxu1 %v3318_v24  ;;  %v1143_v24 = vld [vmem:[%s4252_s16 + $0xf0] sm:$0xff]  ;;  %v3865_v57 = vld [vmem:[%s4257_s22 + $0xe8] sm:$0xff]  }
 0x55f   : > { %1415 = vmatprep.subr.bf16.mxu1 %v3335_v37  ;;  %v3844_v37 = vld [vmem:[%s4257_s22 + $0x40] sm:$0xff]  }
 0x562   : > { %1416 = vmatpush1.bf16.msra.mxu1 %v3334_v36  ;;  %v3346_v36 = vcombine.low %v1136_v31, %v1144_v23 }
 0x563   : > { %1495 = vmatprep.subr.bf16.mxu1 %v3323_v45  ;;  %v3853_v45 = vld [vmem:[%s4257_s22 + $0xd0] sm:$0xff]  }
 0x630   : > { %v1081_v10 = vpop.f32.mrb[16].mxu1 }
 0x631   : > { %v1082_v11 = vadd.f32 %v1081_v10, %v1031_v8  ;;  %v3754_v12 = vpop.f32.mrb[17].mxu1  ;;  %v3325_v8 = vcombine.high %v1117_v63, %v1125_v0  ;;  %v3327_v10 = vcombine.high %v1118_v1, %v1126_v3 }
 0x632   : > { %v1084_v13 = vpop.f32.mrb[18].mxu1  ;;  %v1141_v12 = vld [vmem:[%s4252_s16 + $0xe0] sm:$0xff] }
 0x633   : > { %v3755_v14 = vpop.f32.mrb[19].mxu1  ;;  %v1087_v15 = vadd.f32 %v1082_v11, %v4270_v4  ;;  %v3316_v4 = vcombine.low %v1113_v26, %v1121_v27  ;;  %v1133_v11 = vld [vmem:[%s4252_s16 + $0xa0] sm:$0xff]  ;;  %v1134_v13 = vld [vmem:[%s4252_s16 + $0xa8] sm:$0xff]  ;;  %v1128_v26 = vld [vmem:[%s4252_s16 + $0x78] sm:$0xff] }
 0x634   : > { %v1142_v14 = vld [vmem:[%s4252_s16 + $0xe8] sm:$0xff]  ;;  %v3340_v27 = vcombine.low %v1133_v11, %v1141_v12 }
 0x635   : > { %v1088_v17 = vsel %vm490_vm2, %v1087_v15, 0.0  ;;  %1373 = vmatpush1.bf16.msra.mxu0 %v3316_v4  ;;  %v3342_v28 = vcombine.low %v1134_v13, %v1142_v14  ;;  %v1135_v4 = vld [vmem:[%s4252_s16 + $0xb0] sm:$0xff] }
 0x636   : > { %1089 = vadd.xlane.f32.xlu1 %v1088_v17  ;;  %1374 = vmatprep.subr.bf16.mxu0 %v3333_v33  ;;  %v3326_v17 = vcombine.low %v1118_v1, %v1126_v3  ;;  %v3345_v33 = vcombine.high %v1135_v4, %v1143_v24  ;;  %v3873_v1 = vld [vmem:[%s4257_s22 + $0xf8] sm:$0xff]  }
 0x637   : > { %v3874_v3 = vld [vmem:[%s4257_s22 + $0x38] sm:$0xff]  }
 0x639   : > { %1375 = vmatpush1.bf16.msra.mxu0 %v3332_v35  ;;  %v3344_v35 = vcombine.low %v1135_v4, %v1143_v24 }
 0x63a   : > { %1454 = vmatprep.subr.bf16.mxu0 %v3321_v41  ;;  %v3848_v41 = vld [vmem:[%s4257_s22 + $0x48] sm:$0xff]  }
 0x6c3   : > { %v1090_v18 = vpop.xlane.xlu1 %1089 }
 0x6c4   : > { %v1092_v19 = vmul.f32 0.03125, %v1090_v18  ;;  %v3341_v18 = vcombine.high %v1133_v11, %v1141_v12  ;;  %v455_v11 = vld [vmem:[%s4262_s18 + $0x10] sm:$0xff]  ;;  %v454_v12 = vld [vmem:[%s4262_s18 + $0x8] sm:$0xff] }
 0x6c6   : > { %v1093_v21 = vsub.f32 %v1087_v15, %v1092_v19  ;;  %v3324_v15 = vcombine.low %v1117_v63, %v1125_v0  ;;  %v3343_v19 = vcombine.high %v1134_v13, %v1142_v14  ;;  %v3871_v63 = vld [vmem:[%s4257_s22 + $0xb0] sm:$0xff]   ;;  %v3872_v0 = vld [vmem:[%s4257_s22 + $0x78] sm:$0xff]  }
 0x6c7   : > { %v456_v13 = vld [vmem:[%s4262_s18 + $0x18] sm:$0xff] }
 0x6c8   : > { %v1094_v22 = vmul.f32 %v1093_v21, %v1093_v21 }
 0x6ca   : > { %v1095_v25 = vsel %vm490_vm2, %v1094_v22, 0.0  ;;  %v1127_v22 = vld [vmem:[%s4252_s16 + $0x70] sm:$0xff] }
 0x6cb   : > { %1096 = vadd.xlane.f32.xlu0 %v1095_v25  ;;  %v1120_v25 = vld [vmem:[%s4252_s16 + $0x38] sm:$0xff] }
 0x6cc   : > { %v3331_v30 = vcombine.high %v1120_v25, %v1128_v26  ;;  %v3330_v32 = vcombine.low %v1120_v25, %v1128_v26 }
 0x758   : > { %v1097_v46 = vpop.xlane.xlu0 %1096 }
 0x759   : > { %v1098_v47 = vmul.f32 0.03125, %v1097_v46  ;;  %v3854_v46 = vld [vmem:[%s4257_s22 + $0x10] sm:$0xff]  }
 0x75b   : > { %v1099_v48 = vadd.f32 1e-05, %v1098_v47  ;;  %v3855_v47 = vld [vmem:[%s4257_s22 + $0x90] sm:$0xff]  }
 0x75d   : > { %3988 = vrsqrt.f32 %v1099_v48  ;;  %v3856_v48 = vld [vmem:[%s4257_s22 + $0x58] sm:$0xff]  }
 0x767   : > { %v3989_v52 = vpop.eup %3988 }
 0x768   : > { %v1101_v54 = vmul.f32 %v3989_v52, %v1093_v21  ;;  %v1119_v21 = vld [vmem:[%s4252_s16 + $0x30] sm:$0xff]  ;;  %v3860_v52 = vld [vmem:[%s4257_s22 + $0x60] sm:$0xff]  }
 0x769   : > { %v3329_v29 = vcombine.high %v1119_v21, %v1127_v22  ;;  %v3328_v20 = vcombine.low %v1119_v21, %v1127_v22 }
 0x76a   : > { %v1106_v55 = vmul.f32 %v1105_v51, %v1101_v54  ;;  %v3859_v51 = vld [vmem:[%s4257_s22 + $0x98] sm:$0xff]   ;;  %v3862_v54 = vld [vmem:[%s4257_s22 + $0x20] sm:$0xff]  }
 0x76c   : > { %v4401_v60 = vadd.f32 %v1110_v53, %v1106_v55  ;;  %v3861_v53 = vld [vmem:[%s4257_s22 + $0xe0] sm:$0xff]  }
 0x76d   : > { %v3863_v55 = vld [vmem:[%s4257_s22 + $0xa0] sm:$0xff]  }
 0x76e   : > { %v4405_v2 = vpack.c.bf16 %v4401_v60, %v4401_v60 }
 0x770   : > { %3348 = vmatmul.mubr.msk.bf16.vlgmr.msra.gmra.mrb[20].mxu0 %vm490_vm2, %v4405_v2  ;;  %3349 = vmatmul.mubr.msk.bf16.vlgmr.msra.gmra.mrb[20].mxu1 %vm490_vm2, %v4405_v2 }
 0x771   : > { %1455 = vmatpush1.bf16.msra.mxu0 %v3320_v43  ;;  %1496 = vmatpush1.bf16.msra.mxu1 %v3322_v44  ;;  %v3851_v43 = vld [vmem:[%s4257_s22 + $0x88] sm:$0xff]   ;;  %v3852_v44 = vld [vmem:[%s4257_s22 + $0x50] sm:$0xff]  }
 0x772   : > { %1456 = vmatprep.subr.bf16.mxu0 %v3337_v61  ;;  %1497 = vmatprep.subr.bf16.mxu1 %v3339_v62  ;;  %v3869_v61 = vld [vmem:[%s4257_s22 + $0xf0] sm:$0xff]  }
 0x773   : > { %1486 = vmatprep.mubr.bf16.mxu0 %v4095_v16  ;;  %1527 = vmatprep.mubr.bf16.mxu1 %v4095_v16  ;;  %v3870_v62 = vld [vmem:[%s4257_s22 + $0x30] sm:$0xff]  }
 0x775   : > { %1457 = vmatpush1.bf16.msra.mxu0 %v3336_v5  ;;  %1498 = vmatpush1.bf16.msra.mxu1 %v3338_v6  ;;  %v3875_v5 = vld [vmem:[%s4257_s22 + $0xb8] sm:$0xff]   ;;  %v3876_v6 = vld [vmem:[%s4257_s22 + $0x140] sm:$0xff]  }
 0x776   : > { %1536 = vmatprep.subr.bf16.mxu0 %v3325_v8  ;;  %1577 = vmatprep.subr.bf16.mxu1 %v3327_v10  ;;  %v3877_v8 = vld [vmem:[%s4257_s22 + $0x1c0] sm:$0xff]   ;;  %v4480_v10 = vsub.s32 1, %v4281_v7 }
 0x778   : > { %3350 = vmatmul.mubr.msk.bf16.vlgmr.msra.gmra.mrb[24].mxu0 %vm490_vm2, %v4405_v2  ;;  %3351 = vmatmul.mubr.msk.bf16.vlgmr.msra.gmra.mrb[24].mxu1 %vm490_vm2, %v4405_v2  ;;  %v1148_v14 = vrot.slane %v4285_v9, %v4480_v10 }
 0x779   : > { %1537 = vmatpush1.bf16.msra.mxu0 %v3324_v15  ;;  %1578 = vmatpush1.bf16.msra.mxu1 %v3326_v17  ;;  %v1156_v15 = vrot.slane %v455_v11, %v4480_v10  ;;  %v1152_v17 = vrot.slane %v454_v12, %v4480_v10 }
 0x77a   : > { %1538 = vmatprep.subr.bf16.mxu0 %v3341_v18  ;;  %1579 = vmatprep.subr.bf16.mxu1 %v3343_v19  ;;  %v1160_v18 = vrot.slane %v456_v13, %v4480_v10  ;;  %v3890_v13 = vld [vmem:[%s4257_s22 + $0x118] sm:$0xff]  }
 0x77b   : > { %1568 = vmatprep.mubr.bf16.mxu0 %v4095_v16  ;;  %1609 = vmatprep.mubr.bf16.mxu1 %v4095_v16 }
 0x77d   : > { %1539 = vmatpush1.bf16.msra.mxu0 %v3340_v27  ;;  %1580 = vmatpush1.bf16.msra.mxu1 %v3342_v28 }
 0x77e   : > { %1618 = vmatprep.subr.bf16.mxu0 %v3329_v29  ;;  %1659 = vmatprep.subr.bf16.mxu1 %v3331_v30 }
 0x780   : > { %3352 = vmatmul.mubr.msk.bf16.vlgmr.msra.gmra.mrb[28].mxu0 %vm490_vm2, %v4405_v2  ;;  %3353 = vmatmul.mubr.msk.bf16.vlgmr.msra.gmra.mrb[28].mxu1 %vm490_vm2, %v4405_v2 }
 0x781   : > { %1619 = vmatpush1.bf16.msra.mxu0 %v3328_v20  ;;  %1660 = vmatpush1.bf16.msra.mxu1 %v3330_v32  ;;  %v458_v20 = vld [vmem:[%s4262_s18 + $0x28] sm:$0xff]  ;;  %v460_v32 = vld [vmem:[%s4262_s18 + $0x38] sm:$0xff] }
 0x782   : > { %1620 = vmatprep.subr.bf16.mxu0 %v3345_v33  ;;  %1661 = vmatprep.subr.bf16.mxu1 %v3347_v34 }
 0x783   : > { %1650 = vmatprep.mubr.bf16.mxu0 %v4095_v16  ;;  %1691 = vmatprep.mubr.bf16.mxu1 %v4095_v16  ;;  %v3850_v16 = vld [vmem:[%s4257_s22 + $0x8] sm:$0xff]  }
 0x785   : > { %1621 = vmatpush1.bf16.msra.mxu0 %v3344_v35  ;;  %1662 = vmatpush1.bf16.msra.mxu1 %v3346_v36 }
 0x786   : > { %3516 = vmatprep.subr.bf16.mxu0 %v3844_v37  ;;  %3538 = vmatprep.subr.bf16.mxu1 %v3845_v38  ;;  %v1168_v37 = vrot.slane %v458_v20, %v4480_v10  ;;  %v1176_v38 = vrot.slane %v460_v32, %v4480_v10  ;;  %v3898_v32 = vld [vmem:[%s4257_s22 + $0x128] sm:$0xff]  }
 0x788   : > { %3354 = vmatmul.mubr.msk.bf16.vlgmr.msra.gmra.mrb[32].mxu0 %vm490_vm2, %v4405_v2  ;;  %3355 = vmatmul.mubr.msk.bf16.vlgmr.msra.gmra.mrb[32].mxu1 %vm490_vm2, %v4405_v2  ;;  %v3868_v2 = vld [vmem:[%s4257_s22 + $0x70] sm:$0xff]  }
 0x789   : > { %3517 = vmatpush3.bf16.msra.mxu0 %v3846_v39  ;;  %3539 = vmatpush3.bf16.msra.mxu1 %v3847_v40  ;;  %v3878_v39 = vld [vmem:[%s4257_s22 + $0x100] sm:$0xff]  }
 0x78a   : > { %3518 = vmatprep.subr.bf16.mxu0 %v3848_v41  ;;  %3540 = vmatprep.subr.bf16.mxu1 %v3849_v42  ;;  %v3879_v40 = vld [vmem:[%s4257_s22 + $0x180] sm:$0xff]  }
 0x78d   : > { %3519 = vmatpush3.bf16.msra.mxu0 %v3850_v16  ;;  %3541 = vmatpush3.bf16.msra.mxu1 %v3851_v43  ;;  %v3880_v16 = vld [vmem:[%s4257_s22 + $0x148] sm:$0xff]  }
 0x78e   : > { %3520 = vmatprep.subr.bf16.mxu0 %v3852_v44  ;;  %3542 = vmatprep.subr.bf16.mxu1 %v3853_v45  ;;  %v3881_v43 = vld [vmem:[%s4257_s22 + $0x1c8] sm:$0xff]  }
 0x791   : > { %3521 = vmatpush3.bf16.msra.mxu0 %v3854_v46  ;;  %3543 = vmatpush3.bf16.msra.mxu1 %v3855_v47 }
 0x792   : > { %3522 = vmatprep.subr.bf16.mxu0 %v3856_v48  ;;  %3544 = vmatprep.subr.bf16.mxu1 %v3857_v49 }
 0x795   : > { %3523 = vmatpush3.bf16.msra.mxu0 %v3858_v50  ;;  %3545 = vmatpush3.bf16.msra.mxu1 %v3859_v51 }
 0x796   : > { %3524 = vmatprep.subr.bf16.mxu0 %v3860_v52  ;;  %3546 = vmatprep.subr.bf16.mxu1 %v3861_v53  ;;  %v3882_v52 = vld [vmem:[%s4257_s22 + $0x108] sm:$0xff]  }
 0x797   : > { %v3883_v53 = vld [vmem:[%s4257_s22 + $0x188] sm:$0xff]  }
 0x799   : > { %3525 = vmatpush3.bf16.msra.mxu0 %v3862_v54  ;;  %3547 = vmatpush3.bf16.msra.mxu1 %v3863_v55 }
 0x79a   : > { %3526 = vmatprep.subr.bf16.mxu0 %v3864_v56  ;;  %3548 = vmatprep.subr.bf16.mxu1 %v3865_v57  ;;  %v3884_v56 = vld [vmem:[%s4257_s22 + $0x150] sm:$0xff]  }
 0x79b   : > { %v3885_v57 = vld [vmem:[%s4257_s22 + $0x1d0] sm:$0xff]  }
 0x79d   : > { %3527 = vmatpush3.bf16.msra.mxu0 %v3866_v58  ;;  %3549 = vmatpush3.bf16.msra.mxu1 %v3867_v59 }
 0x79e   : > { %3528 = vmatprep.subr.bf16.mxu0 %v3868_v2  ;;  %3550 = vmatprep.subr.bf16.mxu1 %v3869_v61 }
 0x7a1   : > { %3529 = vmatpush3.bf16.msra.mxu0 %v3870_v62  ;;  %3551 = vmatpush3.bf16.msra.mxu1 %v3871_v63  ;;  %v3886_v62 = vld [vmem:[%s4257_s22 + $0x110] sm:$0xff]  }
 0x7a2   : > { %3530 = vmatprep.subr.bf16.mxu0 %v3872_v0  ;;  %3552 = vmatprep.subr.bf16.mxu1 %v3873_v1  ;;  %v3887_v63 = vld [vmem:[%s4257_s22 + $0x190] sm:$0xff]   ;;  %v3888_v0 = vld [vmem:[%s4257_s22 + $0x158] sm:$0xff]  }
 0x7a3   : > { %v3889_v1 = vld [vmem:[%s4257_s22 + $0x1d8] sm:$0xff]  }
 0x7a5   : > { %3531 = vmatpush3.bf16.msra.mxu0 %v3874_v3  ;;  %3553 = vmatpush3.bf16.msra.mxu1 %v3875_v5 }
 0x7a6   : > { %3560 = vmatprep.subr.bf16.mxu0 %v3876_v6  ;;  %3582 = vmatprep.subr.bf16.mxu1 %v3877_v8 }
 0x843   : > { %v1406_v19 = vpop.f32.mrb[20].mxu0  ;;  %v1447_v21 = vpop.f32.mrb[20].mxu1 }
 0x844   : > { %v1407_v22 = vadd.f32 %v1406_v19, %v1148_v14  ;;  %v1448_v25 = vadd.f32 %v1447_v21, %v1156_v15  ;;  %v1408_v26 = vpop.f32.mrb[21].mxu0  ;;  %v1449_v27 = vpop.f32.mrb[21].mxu1  ;;  %v3891_v14 = vld [vmem:[%s4257_s22 + $0x198] sm:$0xff]   ;;  %v3893_v19 = vld [vmem:[%s4257_s22 + $0x1e0] sm:$0xff]  }
 0x845   : > { %v1409_v28 = vadd.f32 %v1408_v26, %v1152_v17  ;;  %v1450_v29 = vadd.f32 %v1449_v27, %v1160_v18  ;;  %v1410_v30 = vpop.f32.mrb[22].mxu0  ;;  %v1451_v9 = vpop.f32.mrb[22].mxu1  ;;  %v3892_v18 = vld [vmem:[%s4257_s22 + $0x160] sm:$0xff]   ;;  %v3897_v26 = vld [vmem:[%s4257_s22 + $0x1e8] sm:$0xff]  }
 0x846   : > { %v1700_v4 = vmax.f32 %v1407_v22, 0.0  ;;  %v1702_v24 = vmax.f32 %v1448_v25, 0.0  ;;  %v1411_v31 = vpop.f32.mrb[23].mxu0  ;;  %v1452_v23 = vpop.f32.mrb[23].mxu1  ;;  %v3894_v21 = vld [vmem:[%s4257_s22 + $0x120] sm:$0xff]   ;;  %v3896_v25 = vld [vmem:[%s4257_s22 + $0x168] sm:$0xff]  }
 0x847   : > { %v1701_v33 = vmax.f32 %v1409_v28, 0.0  ;;  %v1703_v34 = vmax.f32 %v1450_v29, 0.0  ;;  %v3895_v22 = vld [vmem:[%s4257_s22 + $0x1a0] sm:$0xff]   ;;  %v459_v28 = vld [vmem:[%s4262_s18 + $0x30] sm:$0xff]  ;;  %v462_v9 = vld [vmem:[%s4262_s18 + $0x48] sm:$0xff] }
 0x848   : > { %v1716_v41 = vpack.c.bf16 %v1700_v4, %v1700_v4  ;;  %v1718_v42 = vpack.c.bf16 %v1702_v24, %v1702_v24  ;;  %v457_v27 = vld [vmem:[%s4262_s18 + $0x20] sm:$0xff]  ;;  %v464_v31 = vld [vmem:[%s4262_s18 + $0x58] sm:$0xff] }
 0x849   : > { %v1717_v35 = vpack.c.bf16 %v1701_v33, %v1701_v33  ;;  %v1719_v36 = vpack.c.bf16 %v1703_v34, %v1703_v34  ;;  %v3899_v33 = vld [vmem:[%s4257_s22 + $0x1a8] sm:$0xff]   ;;  %v1164_v34 = vrot.slane %v457_v27, %v4480_v10  ;;  %v461_v27 = vld [vmem:[%s4262_s18 + $0x40] sm:$0xff] }
 0x84b   : > { %v4498_v44 = vpop.f32.mrb[24].mxu0  ;;  %v4500_v45 = vpop.f32.mrb[24].mxu1  ;;  %2792 = vmatprep.mubr.bf16.mxu0 %v1717_v35  ;;  %2832 = vmatprep.mubr.bf16.mxu1 %v1719_v36  ;;  %v1172_v35 = vrot.slane %v459_v28, %v4480_v10  ;;  %v3929_v28 = vld [vmem:[%s4257_s22 + $0x2e8] sm:$0xff]  }
 0x84c   : > { %v1490_v46 = vpop.f32.mrb[25].mxu0  ;;  %v1531_v47 = vpop.f32.mrb[25].mxu1  ;;  %2793 = vmatmul.mubr.bf16.vlgmr.msra.gmra.mrb[36].mxu0 %v1716_v41  ;;  %2833 = vmatmul.mubr.bf16.vlgmr.msra.gmra.mrb[36].mxu1 %v1718_v42  ;;  %v1192_v41 = vrot.slane %v464_v31, %v4480_v10  ;;  %v3902_v42 = vld [vmem:[%s4257_s22 + $0x130] sm:$0xff]   ;;  %v466_v31 = vld [vmem:[%s4262_s18 + $0x68] sm:$0xff] }
 0x84d   : > { %v1491_v48 = vadd.f32 %v1490_v46, %v1168_v37  ;;  %v1532_v49 = vadd.f32 %v1531_v47, %v1176_v38  ;;  %3561 = vmatpush3.bf16.msra.mxu0 %v3878_v39  ;;  %3583 = vmatpush3.bf16.msra.mxu1 %v3879_v40  ;;  %v1492_v50 = vpop.f32.mrb[26].mxu0  ;;  %v1533_v51 = vpop.f32.mrb[26].mxu1  ;;  %v3900_v38 = vld [vmem:[%s4257_s22 + $0x170] sm:$0xff]   ;;  %v1184_v40 = vrot.slane %v462_v9, %v4480_v10  ;;  %v3904_v47 = vld [vmem:[%s4257_s22 + $0x178] sm:$0xff]  }
 0x84e   : > { %v1493_v54 = vpop.f32.mrb[27].mxu0  ;;  %v1534_v55 = vpop.f32.mrb[27].mxu1  ;;  %3562 = vmatprep.subr.bf16.mxu0 %v3880_v16  ;;  %3584 = vmatprep.subr.bf16.mxu1 %v3881_v43  ;;  %v3901_v39 = vld [vmem:[%s4257_s22 + $0x1f0] sm:$0xff]   ;;  %v1489_v43 = vadd.f32 %v4498_v44, %v1164_v34  ;;  %v1530_v46 = vadd.f32 %v4500_v45, %v1172_v35  ;;  %v3906_v51 = vld [vmem:[%s4257_s22 + $0x138] sm:$0xff]   ;;  %v3908_v44 = vld [vmem:[%s4257_s22 + $0x240] sm:$0xff]  }
 0x84f   : > { %v1705_v58 = vmax.f32 %v1491_v48, 0.0  ;;  %v1707_v59 = vmax.f32 %v1532_v49, 0.0  ;;  %v3903_v16 = vld [vmem:[%s4257_s22 + $0x1b0] sm:$0xff]   ;;  %v3905_v48 = vld [vmem:[%s4257_s22 + $0x1f8] sm:$0xff]   ;;  %v3909_v45 = vld [vmem:[%s4257_s22 + $0x2c0] sm:$0xff]  }
 0x850   : > { %v1706_v54 = vmax.f32 %v1530_v46, 0.0  ;;  %v463_v9 = vld [vmem:[%s4262_s18 + $0x50] sm:$0xff] }
 0x851   : > { %v1721_v2 = vpack.c.bf16 %v1705_v58, %v1705_v58  ;;  %v1723_v61 = vpack.c.bf16 %v1707_v59, %v1707_v59  ;;  %3563 = vmatpush3.bf16.msra.mxu0 %v3882_v52  ;;  %3585 = vmatpush3.bf16.msra.mxu1 %v3883_v53  ;;  %v3907_v52 = vld [vmem:[%s4257_s22 + $0x1b8] sm:$0xff]   ;;  %v1704_v53 = vmax.f32 %v1489_v43, 0.0  ;;  %v3932_v34 = vld [vmem:[%s4257_s22 + $0x270] sm:$0xff]   ;;  %v1188_v35 = vrot.slane %v463_v9, %v4480_v10 }
 0x852   : > { %3564 = vmatprep.subr.bf16.mxu0 %v3884_v56  ;;  %3586 = vmatprep.subr.bf16.mxu1 %v3885_v57  ;;  %v3910_v57 = vld [vmem:[%s4257_s22 + $0x200] sm:$0xff]   ;;  %v1722_v59 = vpack.c.bf16 %v1706_v54, %v1706_v54  ;;  %v3937_v43 = vld [vmem:[%s4257_s22 + $0x2f8] sm:$0xff]   ;;  %v3966_v9 = vld [vmem:[%s4257_s22 + $0x330] sm:$0xff]  }
 0x853   : > { %v4510_v3 = vpop.f32.mrb[28].mxu0  ;;  %v4512_v5 = vpop.f32.mrb[28].mxu1  ;;  %2872 = vmatprep.mubr.bf16.mxu0 %v1721_v2  ;;  %2912 = vmatprep.mubr.bf16.mxu1 %v1723_v61  ;;  %v1720_v58 = vpack.c.bf16 %v1704_v53, %v1704_v53  ;;  %v3911_v2 = vld [vmem:[%s4257_s22 + $0x280] sm:$0xff]  }
 0x854   : > { %v1572_v6 = vpop.f32.mrb[29].mxu0  ;;  %v1613_v8 = vpop.f32.mrb[29].mxu1 }
 0x855   : > { %3565 = vmatpush3.bf16.msra.mxu0 %v3886_v62  ;;  %3587 = vmatpush3.bf16.msra.mxu1 %v3887_v63  ;;  %v1574_v11 = vpop.f32.mrb[30].mxu0  ;;  %v1615_v12 = vpop.f32.mrb[30].mxu1  ;;  %v1573_v49 = vadd.f32 %v1572_v6, %v1184_v40  ;;  %v1614_v50 = vadd.f32 %v1613_v8, %v1192_v41  ;;  %v3912_v62 = vld [vmem:[%s4257_s22 + $0x248] sm:$0xff]   ;;  %v3916_v8 = vld [vmem:[%s4257_s22 + $0x250] sm:$0xff]  }
 0x856   : > { %v1575_v15 = vpop.f32.mrb[31].mxu0  ;;  %v1616_v17 = vpop.f32.mrb[31].mxu1  ;;  %3566 = vmatprep.subr.bf16.mxu0 %v3888_v0  ;;  %3588 = vmatprep.subr.bf16.mxu1 %v3889_v1  ;;  %v3913_v63 = vld [vmem:[%s4257_s22 + $0x2c8] sm:$0xff]   ;;  %v3917_v11 = vld [vmem:[%s4257_s22 + $0x2d0] sm:$0xff]  }
 0x857   : > { %v1709_v55 = vmax.f32 %v1573_v49, 0.0  ;;  %v1711_v56 = vmax.f32 %v1614_v50, 0.0  ;;  %v3914_v1 = vld [vmem:[%s4257_s22 + $0x208] sm:$0xff]   ;;  %v3918_v12 = vld [vmem:[%s4257_s22 + $0x210] sm:$0xff]   ;;  %v3921_v15 = vld [vmem:[%s4257_s22 + $0x2d8] sm:$0xff]  }
 0x858   : > { %v3915_v6 = vld [vmem:[%s4257_s22 + $0x288] sm:$0xff]   ;;  %v3922_v17 = vld [vmem:[%s4257_s22 + $0x218] sm:$0xff]   ;;  %v3935_v41 = vld [vmem:[%s4257_s22 + $0x2b0] sm:$0xff]  }
 0x859   : > { %3567 = vmatpush3.bf16.msra.mxu0 %v3890_v13  ;;  %3589 = vmatpush3.bf16.msra.mxu1 %v3891_v14  ;;  %v1725_v61 = vpack.c.bf16 %v1709_v55, %v1709_v55  ;;  %v1727_v0 = vpack.c.bf16 %v1711_v56, %v1711_v56  ;;  %v3919_v13 = vld [vmem:[%s4257_s22 + $0x290] sm:$0xff]   ;;  %v3920_v14 = vld [vmem:[%s4257_s22 + $0x258] sm:$0xff]   ;;  %v3940_v50 = vld [vmem:[%s4257_s22 + $0x340] sm:$0xff]  }
 0x85a   : > { %3568 = vmatprep.subr.bf16.mxu0 %v3892_v18  ;;  %3590 = vmatprep.subr.bf16.mxu1 %v3893_v19  ;;  %v3923_v18 = vld [vmem:[%s4257_s22 + $0x298] sm:$0xff]   ;;  %v3924_v19 = vld [vmem:[%s4257_s22 + $0x260] sm:$0xff]   ;;  %v3945_v56 = vld [vmem:[%s4257_s22 + $0x3c8] sm:$0xff]  }
 0x85b   : > { %v4524_v29 = vpop.f32.mrb[32].mxu0  ;;  %v4526_v30 = vpop.f32.mrb[32].mxu1 }
 0x85c   : > { %v4529_v4 = vpop.f32.mrb[33].mxu0  ;;  %v4531_v24 = vpop.f32.mrb[33].mxu1 }
 0x85d   : > { %3569 = vmatpush3.bf16.msra.mxu0 %v3894_v21  ;;  %3591 = vmatpush3.bf16.msra.mxu1 %v3895_v22  ;;  %v1656_v23 = vpop.f32.mrb[34].mxu0  ;;  %v1697_v20 = vpop.f32.mrb[34].mxu1  ;;  %v3925_v21 = vld [vmem:[%s4257_s22 + $0x2e0] sm:$0xff]  }
 0x85e   : > { %v1657_v36 = vpop.f32.mrb[35].mxu0  ;;  %v1698_v37 = vpop.f32.mrb[35].mxu1  ;;  %3570 = vmatprep.subr.bf16.mxu0 %v3896_v25  ;;  %3592 = vmatprep.subr.bf16.mxu1 %v3897_v26  ;;  %v3926_v22 = vld [vmem:[%s4257_s22 + $0x220] sm:$0xff]   ;;  %v3928_v26 = vld [vmem:[%s4257_s22 + $0x268] sm:$0xff]   ;;  %v1180_v20 = vrot.slane %v461_v27, %v4480_v10 }
 0x85f   : > { %v3927_v25 = vld [vmem:[%s4257_s22 + $0x2a0] sm:$0xff]   ;;  %v3930_v23 = vld [vmem:[%s4257_s22 + $0x228] sm:$0xff]   ;;  %v3933_v36 = vld [vmem:[%s4257_s22 + $0x2f0] sm:$0xff]   ;;  %v1200_v37 = vrot.slane %v466_v31, %v4480_v10 }
 0x860   : > { %v1571_v40 = vadd.f32 %v4510_v3, %v1180_v20  ;;  %v3939_v3 = vld [vmem:[%s4257_s22 + $0x2b8] sm:$0xff]  }
 0x861   : > { %3571 = vmatpush3.bf16.msra.mxu0 %v3898_v32  ;;  %3593 = vmatpush3.bf16.msra.mxu1 %v3899_v33  ;;  %v468_v32 = vld [vmem:[%s4262_s18 + $0x78] sm:$0xff]  ;;  %v3931_v33 = vld [vmem:[%s4257_s22 + $0x2a8] sm:$0xff]   ;;  %v1655_v46 = vadd.f32 %v4529_v4, %v1200_v37  ;;  %v3942_v4 = vld [vmem:[%s4257_s22 + $0x300] sm:$0xff]  }
 0x862   : > { %3572 = vmatprep.subr.bf16.mxu0 %v3900_v38  ;;  %3594 = vmatprep.subr.bf16.mxu1 %v3901_v39  ;;  %v1208_v38 = vrot.slane %v468_v32, %v4480_v10  ;;  %v3934_v39 = vld [vmem:[%s4257_s22 + $0x230] sm:$0xff]   ;;  %v1708_v49 = vmax.f32 %v1571_v40, 0.0  ;;  %v3968_v20 = vld [vmem:[%s4257_s22 + $0x378] sm:$0xff]   ;;  %v4634_v40 = vld [vmem:[%s4262_s18] sm:$0xff] }
 0x864   : > { %v1724_v54 = vpack.c.bf16 %v1708_v49, %v1708_v49 }
 0x865   : > { %3573 = vmatpush3.bf16.msra.mxu0 %v3902_v42  ;;  %3595 = vmatpush3.bf16.msra.mxu1 %v3903_v16  ;;  %v3936_v42 = vld [vmem:[%s4257_s22 + $0x278] sm:$0xff]   ;;  %v1612_v16 = vadd.f32 %v4512_v5, %v1188_v35  ;;  %v3941_v5 = vld [vmem:[%s4257_s22 + $0x3c0] sm:$0xff]  }
 0x866   : > { %3574 = vmatprep.subr.bf16.mxu0 %v3904_v47  ;;  %3596 = vmatprep.subr.bf16.mxu1 %v3905_v48  ;;  %v1696_v47 = vadd.f32 %v4531_v24, %v1208_v38  ;;  %v3938_v48 = vld [vmem:[%s4257_s22 + $0x238] sm:$0xff]   ;;  %v3943_v24 = vld [vmem:[%s4257_s22 + $0x380] sm:$0xff]   ;;  %v1990_v38 = vsub.s32 3, %v4281_v7 }
 0x868   : > { %v1715_v53 = vmax.f32 %v1696_v47, 0.0 }
 0x869   : > { %3575 = vmatpush3.bf16.msra.mxu0 %v3906_v51  ;;  %3597 = vmatpush3.bf16.msra.mxu1 %v3907_v52  ;;  %v1710_v51 = vmax.f32 %v1612_v16, 0.0  ;;  %v1713_v52 = vmax.f32 %v1655_v46, 0.0 }
 0x86a   : > { %3604 = vmatprep.subr.bf16.mxu0 %v3908_v44  ;;  %3626 = vmatprep.subr.bf16.mxu1 %v3909_v45  ;;  %v3944_v45 = vld [vmem:[%s4257_s22 + $0x348] sm:$0xff]  }
 0x86b   : > { %v1726_v44 = vpack.c.bf16 %v1710_v51, %v1710_v51  ;;  %v1729_v55 = vpack.c.bf16 %v1713_v52, %v1713_v52 }
 0x86c   : > { %2873 = vmatmul.mubr.bf16.vlgmr.msra.gmra.mrb[40].mxu0 %v1720_v58  ;;  %2913 = vmatmul.mubr.bf16.vlgmr.msra.gmra.mrb[40].mxu1 %v1722_v59  ;;  %v3946_v58 = vld [vmem:[%s4257_s22 + $0x308] sm:$0xff]  }
 0x86d   : > { %3605 = vmatpush3.bf16.msra.mxu0 %v3910_v57  ;;  %2952 = vmatprep.mubr.bf16.mxu0 %v1725_v61  ;;  %v1731_v57 = vpack.c.bf16 %v1715_v53, %v1715_v53  ;;  %v3947_v59 = vld [vmem:[%s4257_s22 + $0x388] sm:$0xff]   ;;  %v3949_v61 = vld [vmem:[%s4257_s22 + $0x3d0] sm:$0xff]  }
 0x86e   : > { %3627 = vmatpush3.bf16.msra.mxu1 %v3911_v2  ;;  %2992 = vmatprep.mubr.bf16.mxu1 %v1727_v0  ;;  %v3948_v2 = vld [vmem:[%s4257_s22 + $0x350] sm:$0xff]   ;;  %v3952_v0 = vld [vmem:[%s4257_s22 + $0x358] sm:$0xff]  }
 0x86f   : > { %3606 = vmatprep.subr.bf16.mxu0 %v3912_v62  ;;  %3628 = vmatprep.subr.bf16.mxu1 %v3913_v63  ;;  %v3950_v62 = vld [vmem:[%s4257_s22 + $0x310] sm:$0xff]  }
 0x870   : > { %v3951_v63 = vld [vmem:[%s4257_s22 + $0x390] sm:$0xff]  }
 0x871   : > { %3607 = vmatpush3.bf16.msra.mxu0 %v3914_v1  ;;  %v3953_v1 = vld [vmem:[%s4257_s22 + $0x3d8] sm:$0xff]  }
 0x872   : > { %3629 = vmatpush3.bf16.msra.mxu1 %v3915_v6  ;;  %3608 = vmatprep.subr.bf16.mxu0 %v3916_v8  ;;  %v3954_v6 = vld [vmem:[%s4257_s22 + $0x318] sm:$0xff]  }
 0x873   : > { %3630 = vmatprep.subr.bf16.mxu1 %v3917_v11  ;;  %v3955_v8 = vld [vmem:[%s4257_s22 + $0x398] sm:$0xff]   ;;  %v3956_v11 = vld [vmem:[%s4257_s22 + $0x360] sm:$0xff]  }
 0x875   : > { %3609 = vmatpush3.bf16.msra.mxu0 %v3918_v12  ;;  %v3957_v12 = vld [vmem:[%s4257_s22 + $0x3e0] sm:$0xff]  }
 0x876   : > { %3631 = vmatpush3.bf16.msra.mxu1 %v3919_v13  ;;  %3610 = vmatprep.subr.bf16.mxu0 %v3920_v14  ;;  %v3958_v13 = vld [vmem:[%s4257_s22 + $0x320] sm:$0xff]  }
 0x877   : > { %3632 = vmatprep.subr.bf16.mxu1 %v3921_v15  ;;  %v3959_v14 = vld [vmem:[%s4257_s22 + $0x3a0] sm:$0xff]   ;;  %v3960_v15 = vld [vmem:[%s4257_s22 + $0x368] sm:$0xff]  }
 0x879   : > { %3611 = vmatpush3.bf16.msra.mxu0 %v3922_v17  ;;  %v465_v17 = vld [vmem:[%s4262_s18 + $0x60] sm:$0xff] }
 0x87a   : > { %3633 = vmatpush3.bf16.msra.mxu1 %v3923_v18  ;;  %3612 = vmatprep.subr.bf16.mxu0 %v3924_v19  ;;  %v3961_v18 = vld [vmem:[%s4257_s22 + $0x3e8] sm:$0xff]   ;;  %v467_v19 = vld [vmem:[%s4262_s18 + $0x70] sm:$0xff] }
 0x87b   : > { %3634 = vmatprep.subr.bf16.mxu1 %v3925_v21  ;;  %v3962_v21 = vld [vmem:[%s4257_s22 + $0x328] sm:$0xff]   ;;  %v1204_v27 = vrot.slane %v467_v19, %v4480_v10 }
 0x87d   : > { %3613 = vmatpush3.bf16.msra.mxu0 %v3926_v22  ;;  %v1196_v22 = vrot.slane %v465_v17, %v4480_v10  ;;  %v1694_v32 = vadd.f32 %v4526_v30, %v1204_v27  ;;  %v3971_v10 = vld [vmem:[%s4257_s22 + $0x3b8] sm:$0xff]  }
 0x87e   : > { %3635 = vmatpush3.bf16.msra.mxu1 %v3927_v25  ;;  %3614 = vmatprep.subr.bf16.mxu0 %v3928_v26  ;;  %v3963_v25 = vld [vmem:[%s4257_s22 + $0x3a8] sm:$0xff]   ;;  %v3964_v26 = vld [vmem:[%s4257_s22 + $0x370] sm:$0xff]  }
 0x87f   : > { %3636 = vmatprep.subr.bf16.mxu1 %v3929_v28  ;;  %v3965_v28 = vld [vmem:[%s4257_s22 + $0x3f0] sm:$0xff]   ;;  %v1653_v31 = vadd.f32 %v4524_v29, %v1196_v22 }
 0x881   : > { %3615 = vmatpush3.bf16.msra.mxu0 %v3930_v23  ;;  %v3967_v23 = vld [vmem:[%s4257_s22 + $0x3b0] sm:$0xff]   ;;  %v1712_v35 = vmax.f32 %v1653_v31, 0.0 }
 0x882   : > { %3637 = vmatpush3.bf16.msra.mxu1 %v3931_v33  ;;  %3616 = vmatprep.subr.bf16.mxu0 %v3932_v34  ;;  %v3969_v33 = vld [vmem:[%s4257_s22 + $0x3f8] sm:$0xff]  }
 0x883   : > { %3638 = vmatprep.subr.bf16.mxu1 %v3933_v36  ;;  %v3970_v34 = vld [vmem:[%s4257_s22 + $0x338] sm:$0xff]   ;;  %v1714_v36 = vmax.f32 %v1694_v32, 0.0  ;;  %v1728_v37 = vpack.c.bf16 %v1712_v35, %v1712_v35 }
 0x885   : > { %3617 = vmatpush3.bf16.msra.mxu0 %v3934_v39  ;;  %v1730_v29 = vpack.c.bf16 %v1714_v36, %v1714_v36 }
 0x886   : > { %3639 = vmatpush3.bf16.msra.mxu1 %v3935_v41  ;;  %3618 = vmatprep.subr.bf16.mxu0 %v3936_v42  ;;  %v1991_v41 = vrot.slane %v4634_v40, %v1990_v38  ;;  %v3101_v38 = vsub.s32 7, %v4281_v7 }
 0x887   : > { %3640 = vmatprep.subr.bf16.mxu1 %v3937_v43 }
 0x889   : > { %3619 = vmatpush3.bf16.msra.mxu0 %v3938_v48 }
 0x88a   : > { %3641 = vmatpush3.bf16.msra.mxu1 %v3939_v3  ;;  %3648 = vmatprep.subr.bf16.mxu0 %v3940_v50 }
 0x88b   : > { %3670 = vmatprep.subr.bf16.mxu1 %v3941_v5 }
 0x88c   : > { %2953 = vmatmul.mubr.bf16.vlgmr.msra.gmra.mrb[44].mxu0 %v1724_v54 }
 0x88d   : > { %2993 = vmatmul.mubr.bf16.vlgmr.msra.gmra.mrb[44].mxu1 %v1726_v44  ;;  %3649 = vmatpush3.bf16.msra.mxu0 %v3942_v4 }
 0x88e   : > { %3032 = vmatprep.mubr.bf16.mxu0 %v1729_v55  ;;  %3671 = vmatpush3.bf16.msra.mxu1 %v3943_v24 }
 0x88f   : > { %3072 = vmatprep.mubr.bf16.mxu1 %v1731_v57  ;;  %3650 = vmatprep.subr.bf16.mxu0 %v3944_v45 }
 0x890   : > { %3672 = vmatprep.subr.bf16.mxu1 %v3945_v56 }
 0x891   : > { %3651 = vmatpush3.bf16.msra.mxu0 %v3946_v58 }
 0x892   : > { %3673 = vmatpush3.bf16.msra.mxu1 %v3947_v59  ;;  %3652 = vmatprep.subr.bf16.mxu0 %v3948_v2 }
 0x893   : > { %3674 = vmatprep.subr.bf16.mxu1 %v3949_v61 }
 0x895   : > { %3653 = vmatpush3.bf16.msra.mxu0 %v3950_v62 }
 0x896   : > { %3675 = vmatpush3.bf16.msra.mxu1 %v3951_v63  ;;  %3654 = vmatprep.subr.bf16.mxu0 %v3952_v0 }
 0x897   : > { %3676 = vmatprep.subr.bf16.mxu1 %v3953_v1 }
 0x899   : > { %3655 = vmatpush3.bf16.msra.mxu0 %v3954_v6 }
 0x89a   : > { %3677 = vmatpush3.bf16.msra.mxu1 %v3955_v8  ;;  %3656 = vmatprep.subr.bf16.mxu0 %v3956_v11 }
 0x89b   : > { %3678 = vmatprep.subr.bf16.mxu1 %v3957_v12 }
 0x89d   : > { %3657 = vmatpush3.bf16.msra.mxu0 %v3958_v13 }
 0x89e   : > { %3679 = vmatpush3.bf16.msra.mxu1 %v3959_v14  ;;  %3658 = vmatprep.subr.bf16.mxu0 %v3960_v15 }
 0x89f   : > { %3680 = vmatprep.subr.bf16.mxu1 %v3961_v18 }
 0x8a1   : > { %3659 = vmatpush3.bf16.msra.mxu0 %v3962_v21 }
 0x8a2   : > { %3681 = vmatpush3.bf16.msra.mxu1 %v3963_v25  ;;  %3660 = vmatprep.subr.bf16.mxu0 %v3964_v26 }
 0x8a3   : > { %3682 = vmatprep.subr.bf16.mxu1 %v3965_v28 }
 0x8a5   : > { %3661 = vmatpush3.bf16.msra.mxu0 %v3966_v9 }
 0x8a6   : > { %3683 = vmatpush3.bf16.msra.mxu1 %v3967_v23  ;;  %3662 = vmatprep.subr.bf16.mxu0 %v3968_v20 }
 0x8a7   : > { %3684 = vmatprep.subr.bf16.mxu1 %v3969_v33 }
 0x8a9   : > { %3663 = vmatpush3.bf16.msra.mxu0 %v3970_v34 }
 0x8aa   : > { %3685 = vmatpush3.bf16.msra.mxu1 %v3971_v10 }
 0x8ac   : > { %3033 = vmatmul.mubr.bf16.vlgmr.msra.gmra.mrb[48].mxu0 %v1728_v37 }
 0x8ad   : > { %3073 = vmatmul.mubr.bf16.vlgmr.msra.gmra.mrb[48].mxu1 %v1730_v29  ;;  %v3096_v29 = vsub.s32 6, %v4281_v7 }
 0x91f   : > { %v3532_v30 = vpop.f32.mrb[36].mxu0  ;;  %v3554_v39 = vpop.f32.mrb[36].mxu1 }
 0x920   : > { %v3533_v42 = vpop.f32.mrb[37].mxu0  ;;  %v3555_v16 = vpop.f32.mrb[37].mxu1 }
 0x921   : > { %v3534_v43 = vadd.f32 %v3533_v42, %v3532_v30  ;;  %v3556_v46 = vadd.f32 %v3555_v16, %v3554_v39  ;;  %v3535_v47 = vpop.f32.mrb[38].mxu0  ;;  %v3557_v48 = vpop.f32.mrb[38].mxu1  ;;  %v3102_v39 = vrot.slane %v4634_v40, %v3101_v38 }
 0x922   : > { %v3536_v49 = vpop.f32.mrb[39].mxu0  ;;  %v3558_v3 = vpop.f32.mrb[39].mxu1 }
 0x923   : > { %v2795_v50 = vadd.f32 %v3534_v43, %v1991_v41 }
 0x925   : > { %v2835_v51 = vadd.f32 %v3556_v46, %v2795_v50 }
 0x93f   : > { %v3576_v5 = vpop.f32.mrb[40].mxu0  ;;  %v3598_v52 = vpop.f32.mrb[40].mxu1 }
 0x940   : > { %v3577_v53 = vpop.f32.mrb[41].mxu0  ;;  %v3599_v4 = vpop.f32.mrb[41].mxu1 }
 0x941   : > { %v3578_v54 = vadd.f32 %v3577_v53, %v3576_v5  ;;  %v3600_v24 = vadd.f32 %v3599_v4, %v3598_v52  ;;  %v3579_v44 = vpop.f32.mrb[42].mxu0  ;;  %v3601_v45 = vpop.f32.mrb[42].mxu1 }
 0x942   : > { %v3580_v55 = vpop.f32.mrb[43].mxu0  ;;  %v3602_v56 = vpop.f32.mrb[43].mxu1 }
 0x943   : > { %v2875_v57 = vadd.f32 %v3578_v54, %v2835_v51 }
 0x945   : > { %v2915_v58 = vadd.f32 %v3600_v24, %v2875_v57 }
 0x95f   : > { %v3620_v59 = vpop.f32.mrb[44].mxu0 }
 0x960   : > { %v3642_v2 = vpop.f32.mrb[44].mxu1  ;;  %v3621_v61 = vpop.f32.mrb[45].mxu0 }
 0x961   : > { %v3622_v62 = vadd.f32 %v3621_v61, %v3620_v59  ;;  %v3643_v63 = vpop.f32.mrb[45].mxu1  ;;  %v3623_v0 = vpop.f32.mrb[46].mxu0 }
 0x962   : > { %v3644_v1 = vadd.f32 %v3643_v63, %v3642_v2  ;;  %v3645_v6 = vpop.f32.mrb[46].mxu1  ;;  %v3624_v8 = vpop.f32.mrb[47].mxu0 }
 0x963   : > { %v2955_v11 = vadd.f32 %v3622_v62, %v2915_v58  ;;  %v3646_v12 = vpop.f32.mrb[47].mxu1 }
 0x965   : > { %v2995_v13 = vadd.f32 %v3644_v1, %v2955_v11 }
 0x97f   : > { %v3664_v14 = vpop.f32.mrb[48].mxu0 }
 0x980   : > { %v3686_v15 = vpop.f32.mrb[48].mxu1  ;;  %v3665_v17 = vpop.f32.mrb[49].mxu0 }
 0x981   : > { %v3666_v18 = vadd.f32 %v3665_v17, %v3664_v14  ;;  %v3687_v19 = vpop.f32.mrb[49].mxu1  ;;  %v3667_v21 = vpop.f32.mrb[50].mxu0 }
 0x982   : > { %v3688_v22 = vadd.f32 %v3687_v19, %v3686_v15  ;;  %v3689_v25 = vpop.f32.mrb[50].mxu1  ;;  %v3668_v26 = vpop.f32.mrb[51].mxu0 }
 0x983   : > { %v3035_v27 = vadd.f32 %v3666_v18, %v2995_v13  ;;  %v3690_v28 = vpop.f32.mrb[51].mxu1 }
 0x985   : > { %v3075_v9 = vadd.f32 %v3688_v22, %v3035_v27 }
 0x987   : > { %v3080_v31 = vadd.f32 %v3075_v9, %v4401_v60  ;;  %v3097_v60 = vrot.slane %v4634_v40, %v3096_v29 }
 0x989   : > { %v3081_v23 = vsel %vm490_vm2, %v3080_v31, 0.0 }
 0x98a   : > { %3082 = vadd.xlane.f32.xlu0 %v3081_v23 }
 0xa17   : > { %v3083_v20 = vpop.xlane.xlu0 %3082 }
 0xa18   : > { %v3084_v32 = vmul.f32 0.03125, %v3083_v20 }
 0xa1a   : > { %v3085_v33 = vsub.f32 %v3080_v31, %v3084_v32 }
 0xa1c   : > { %v3086_v34 = vmul.f32 %v3085_v33, %v3085_v33 }
 0xa1e   : > { %v3087_v35 = vsel %vm490_vm2, %v3086_v34, 0.0 }
 0xa1f   : > { %3088 = vadd.xlane.f32.xlu1 %v3087_v35 }
 0xaac   : > { %v3089_v10 = vpop.xlane.xlu1 %3088 }
 0xaad   : > { %v3090_v36 = vmul.f32 0.03125, %v3089_v10 }
 0xaaf   : > { %v3091_v37 = vadd.f32 1e-05, %v3090_v36 }
 0xab1   : > { %3990 = vrsqrt.f32 %v3091_v37 }
 0xabb   : > { %v3991_v30 = vpop.eup %3990 }
 0xabc   : > { %v3093_v41 = vmul.f32 %v3991_v30, %v3085_v33  ;;  %3108 = sbr.rel (%p3484_p1) target bundleno = 2915 (0xb63), region = 60 }
 0xabe   : > { %v3098_v42 = vmul.f32 %v3097_v60, %v3093_v41 }
 0xac0   : > { %v3103_v16 = vadd.f32 %v3102_v39, %v3098_v42 }
 0xac2   : > { %3104 = vst.msk [vmem:[#allocation2] sm:$0xff] %vm490_vm2, %v3103_v16  ;;  %v3109_v43 = vmul.f32 (!%p3484_p1), %v3103_v16, %v3103_v16 }
 0xac4   : > { %v3110_v46 = vsel %vm490_vm2, %v3109_v43, 0.0 }
 0xac5   : > { %3111 = vadd.xlane.f32.xlu0 %v3110_v46 }
 0xb52   : > { %v3112_v47 = vpop.xlane.xlu0 %3111 }
 0xb53   : > { %v3113_v7 = vmax.f32 %v3112_v47, 1e-24 }
 0xb55   : > { %3993 = vrsqrt.f32 %v3113_v7 }
 0xb5f   : > { %v3994_v48 = vpop.eup %3993 }
 0xb60   : > { %v3115_v49 = vmul.f32 %v3994_v48, %v3103_v16 }
 0xb62   : > { %3116 = vst.msk [vmem:[%s407_s8] sm:$0xff] %vm490_vm2, %v3115_v49 }
 0xb63 PF: > { %s3486_s30 = sshll.u32 %s4077_s9, 7  ;;  %s4745_s20 = sld [smem:[#allocation18_spill]] }
 0xb64   : > { %s3131_s22 = sshll.u32 %s407_s8, 4  ;;  %s4746_s26 = sand.u32 1, %s4065_s28   ;;  %s3132_s22 = int_to_ptr.vmem [resolvable:$true] %s3131_s22 }
 0xb65   : > { %s3118_s27 = scalar_lea.sflag [#allocation4], %s4746_s26  ;;  %s3995_s18 = scalar_lea.vmem %s3132_s22, 128 }
 0xb66   : > { %p3996_p2 = scmp.ne.s32.totalorder %s3132_s22, %s3995_s18  ;;  %s4102_s0 = smov [#allocation3]  }
 0xb67   : > { %s3999_s2 = sshll.u32 %s4102_s0, 4  ;;  %s4000_s2 = int_to_ptr.vmem [resolvable:$false] %s3999_s2 }
 0xb68   : > { %p3997_p4 = pnand %p3996_p2, %p4197_p3  ;;  %s4001_s29 = scalar_lea.vmem %s4000_s2, 256 }
 0xb69   : > { %s4654_s11 = scalar_lea.hbm %s4745_s20, %s3486_s30  ;;  %p4002_p6 = scmp.lt.s32.totalorder %s3132_s22, %s4000_s2 }
 0xb6a   : > { %p3998_p5 = pneg %p3997_p4  ;;  %p4003_p7 = scmp.lt.s32.totalorder %s4001_s29, %s3995_s18 }
 0xb6c   : > { %p4004_p8 = por %p4003_p7, %p4002_p6 }
 0xb6e   : > { %p4005_p10 = pnand %p4004_p8, %p3998_p5 }
 0xb70   : > { %4008 = shalt.err (!%p4005_p10)
}
 0xb71   : > { %s4009_s9 = scalar_lea.hbm %s4654_s11, 128  ;;  %s4013_s10 = scalar_lea.hbm %s4745_s20, 256 }
 0xb72   : > { %p4010_p11 = scmp.ne.s32.totalorder %s4654_s11, %s4009_s9  ;;  %p4014_p0 = scmp.lt.u32.totalorder %s4654_s11, %s4745_s20 }
 0xb73   : > { %p4015_p1 = scmp.lt.u32.totalorder %s4013_s10, %s4009_s9  ;;  %p4017_p4 = scmp.lt.u32.totalorder %s4009_s9, %s4654_s11 }
 0xb74   : > { %p4011_p12 = pnand %p4010_p11, %p4197_p3 }
 0xb75   : > { %p4016_p2 = por %p4015_p1, %p4014_p0 }
 0xb76   : > { %p4012_p13 = pneg %p4011_p12 }
 0xb77   : > { %p4018_p5 = por %p4017_p4, %p4016_p2 }
 0xb79   : > { %p4019_p6 = pnand %p4018_p5, %p4012_p13 }
 0xb7b   : > { %4022 = shalt.err (!%p4019_p6)
}
 0xb7c   : > { %3756 = dma.vmem_to_hbm [thread:$0]  (%p4197_p3), %s3132_s22, 128, %s4654_s11, %s3118_s27  }
 0xb7d PF: > { %s4747_s17 = sld [smem:[#allocation10_spill]]  ;;  %s4748_s21 = sld [smem:[#allocation6_spill]] }
 0xb83   : > { %p3762_p7 = scmp.ge.s32.totalorder %s4747_s17, 2  ;;  %s3143_s25 = sand.u32 1, %s4748_s21  }
 0xb84   : > { %s3144_s19 = scalar_lea.sflag [#allocation4], %s3143_s25 }
 0xb85   : > { %p3759_p8 = pnand %p3762_p7, %p4207_p9 }
 0xb87   : > { %4056 = dma.done.wait (!%p3759_p8), %s3144_s19, 128  }
 0xb88   : > { %4058 = vsyncadd (!%p3759_p8), %s3144_s19, 4294967168  ;;  %s21_s12 = sadd.s32 1, %s4747_s17   ;;  %s4750_s30 = sld [smem:[#allocation7_spill]] }
 0xb89   : > { %p18_p10 = scmp.ge.s32.totalorder %s21_s12, 6   ;;  %s4751_s29 = sld [smem:[#allocation15_spill]] }
 0xb8a   : > { %s4752_s13 = sld [smem:[#allocation8_spill]]  ;;  %s4753_s9 = sld [smem:[#allocation9_spill]] }
 0xb8b   : > { %s4754_s10 = sld [smem:[#allocation11_spill]]  ;;  %s4755_s11 = sld [smem:[#allocation13_spill]] }
 0xb8c   : > { %s4756_s27 = smov %s4065_s28  ;;  %20 = sbr.rel (!%p18_p10) target bundleno = 9 (0x9), region = 116 }
 0xb8e   : > { %s4757_s28 = smov %s4750_s30 }
 0xb90   : > { %s4758_s30 = smov %s4752_s13 }
 0xb93   :  { %3149 = vsyncpa [#allocation4], 1 }
 0xb94   :  { %3151 = vsyncpa [#allocation4 + $0x1], 1 }

</bundles_post_ra>
